<compile_context>
chip_gen: v5e
topology: v5e:2x2
jax: 0.10.0
libtpu: 0.0.40
codegen_flags: <defaults>
</compile_context>

<pallas_src>
import math
import numpy as np

import jax
import jax.numpy as jnp
from jax import lax
from jax.experimental import pallas as pl
from jax.experimental.pallas import tpu as pltpu

# ----------------------- model hyper-parameters ----------------------------
R_MAX = 5.0
NUM_BESSEL = 8
NUM_POLY_CUTOFF = 6              # p
MAX_ELL = 3
NUM_INTERACTIONS = 2
NUM_ELEMENTS = 4                 # Z
HIDDEN = 32                      # hidden_irreps = "32x0e"  (scalars only)
RADIAL_HIDDEN = 16
AVG_NUM_NEIGHBORS = 4.0
ATOMIC_INTER_SCALE = 1.3
ATOMIC_INTER_SHIFT = 0.1
SH_DIM = (MAX_ELL + 1) ** 2      # 16

# ----------------------- problem sizes (synthetic, small) -------------------
N_SYSTEMS = 4                    # independent systems
N_NODES = 8
N_EDGES = 16
N_GRAPHS = 2

# systems per grid step (2 keeps v7x's two TensorCores busy; use 4 on v5e/v6e)
S_BLK = 2
N_BLOCKS = N_SYSTEMS // S_BLK
BN = S_BLK * N_NODES             # nodes per block
BE = S_BLK * N_EDGES             # edges per block
BG = S_BLK * N_GRAPHS            # graphs per block
NODE_PACK_W = BE + NUM_ELEMENTS + BG     # recv_oh_t | node_attrs | batch_oh
EDGE_PACK_W = 2 * BN + 3                 # diff_oh | send_oh | shifts


# ======================= shared compute helpers =============================
# Used both inside the Pallas kernel (on VMEM values) and by the pure-JAX
# mirror used for the correctness check and the force backward pass.

def _radial_embedding(lengths, inv_len):
    """Bessel basis * polynomial cutoff.  lengths [E,1] -> [E, NUM_BESSEL]."""
    freqs = (math.pi / R_MAX) * (
        lax.broadcasted_iota(jnp.int32, (1, NUM_BESSEL), 1).astype(jnp.float32)
        + 1.0)                                                       # [1,B]
    pref = math.sqrt(2.0 / R_MAX)
    bessel = pref * jnp.sin(lengths * freqs) * inv_len               # [E,B]
    p = float(NUM_POLY_CUTOFF)
    x = lengths * (1.0 / R_MAX)
    x2 = x * x
    x4 = x2 * x2
    x6 = x4 * x2
    x7 = x6 * x
    x8 = x7 * x
    env = (1.0
           - (p + 1.0) * (p + 2.0) / 2.0 * x6
           + p * (p + 2.0) * x7
           - p * (p + 1.0) / 2.0 * x8)
    env = env * (x < 1.0).astype(jnp.float32)                        # [E,1]
    return bessel * env


def _spherical_harmonics_packed(u):
    """Component-normalized real spherical harmonics up to l=3.

    u: [E,3] unit vectors.  Returns a lane-dense [E, SH_DIM] array.
    """
    x = u[:, 0:1]
    y = u[:, 1:2]
    z = u[:, 2:3]
    cols = [jnp.ones_like(x)]                                 # l = 0
    c1 = math.sqrt(3.0)
    cols += [c1 * x, c1 * y, c1 * z]                          # l = 1
    cols += [                                                 # l = 2
        math.sqrt(15.0) * x * y,
        math.sqrt(15.0) * y * z,
        math.sqrt(5.0) / 2.0 * (3.0 * z * z - 1.0),
        math.sqrt(15.0) * x * z,
        math.sqrt(15.0) / 2.0 * (x * x - y * y),
    ]
    cols += [                                                 # l = 3
        math.sqrt(70.0) / 4.0 * y * (3.0 * x * x - y * y),
        math.sqrt(105.0) * x * y * z,
        math.sqrt(42.0) / 4.0 * y * (5.0 * z * z - 1.0),
        math.sqrt(7.0) / 2.0 * z * (5.0 * z * z - 3.0),
        math.sqrt(42.0) / 4.0 * x * (5.0 * z * z - 1.0),
        math.sqrt(105.0) / 2.0 * z * (x * x - y * y),
        math.sqrt(70.0) / 4.0 * x * (x * x - 3.0 * y * y),
    ]
    return jnp.concatenate(cols, axis=-1)                     # [E, SH_DIM]


def _energy_core(pos, node_pack, edge_pack, w_embed_ae, wr1_stack, wr2_bd,
                 w12s, wskip_all, w_ro):
    """Energy forward for one block of S_BLK systems -> [1, BG]."""
    # --- unpack the lane-packed static operands -------------------------------
    recv_oh_t = node_pack[:, :BE]                            # [BN, BE]
    node_attrs = node_pack[:, BE:BE + NUM_ELEMENTS]          # [BN, Z]
    batch_oh = node_pack[:, BE + NUM_ELEMENTS:]              # [BN, BG]
    diff_oh = edge_pack[:, :BN]                              # [BE, BN]
    send_oh = edge_pack[:, BN:2 * BN]                        # [BE, BN]
    shifts = edge_pack[:, 2 * BN:]                           # [BE, 3]

    # --- edge vectors / lengths (single fused gather matmul, one rsqrt) -------
    vec = jnp.dot(diff_oh, pos, preferred_element_type=jnp.float32) + shifts
    len2 = jnp.sum(vec * vec, axis=-1, keepdims=True)        # [BE,1]
    inv_len = lax.rsqrt(jnp.maximum(len2, 1e-12))            # zero-edge guard
    lengths = len2 * inv_len
    u = vec * inv_len
    sh = _spherical_harmonics_packed(u)                      # [BE, SH_DIM]
    edge_feats = _radial_embedding(lengths, inv_len)         # [BE, NB]

    # --- node embedding fused with atomic reference energies ------------------
    emb = jnp.dot(node_attrs, w_embed_ae,
                  preferred_element_type=jnp.float32)        # [BN, H+1]
    h = emb[:, :HIDDEN] * (1.0 / math.sqrt(NUM_ELEMENTS))    # path-norm 1/sqrt(Z)
    node_e0 = emb[:, HIDDEN:]                                # [BN, 1]

    # --- loop-invariant radial MLP / edge gates / skip connections ------------
    r_hid = jax.nn.silu(jnp.dot(edge_feats, wr1_stack,
                                preferred_element_type=jnp.float32))   # [BE,L*RH]
    r_w = jnp.dot(r_hid, wr2_bd, preferred_element_type=jnp.float32)   # [BE,L*SH]
    gates = [jnp.sum(sh * r_w[:, l * SH_DIM:(l + 1) * SH_DIM],
                     axis=-1, keepdims=True)
             for l in range(NUM_INTERACTIONS)]                         # [BE,1]
    skips = jnp.dot(node_attrs, wskip_all,
                    preferred_element_type=jnp.float32)                # [BN,L*H]

    # --- interaction layers + per-layer readouts (simplified scalar MP) -------
    inv_neigh = 1.0 / AVG_NUM_NEIGHBORS
    readout_scale = 1.0 / math.sqrt(HIDDEN)
    node_inter = jnp.zeros_like(node_e0)                     # [BN,1]
    for l in range(NUM_INTERACTIONS):
        w1 = w12s[l, :HIDDEN, :]
        w2 = w12s[l, HIDDEN:, :]
        h_up = jnp.dot(h, w1, preferred_element_type=jnp.float32)      # [BN,H]
        msgs = jnp.dot(send_oh, h_up,
                       preferred_element_type=jnp.float32) * gates[l]  # [BE,H]
        agg = jnp.dot(recv_oh_t, msgs,
                      preferred_element_type=jnp.float32) * inv_neigh  # [BN,H]
        h = (jnp.dot(agg, w2, preferred_element_type=jnp.float32)
             + skips[:, l * HIDDEN:(l + 1) * HIDDEN])                  # [BN,H]
        # readout: VPU broadcast-multiply + lane reduce (no 1-column matmul)
        node_inter = node_inter + jnp.sum(
            h * w_ro[l], axis=-1, keepdims=True) * readout_scale

    # --- scale/shift + e0, then graph scatter-sum (lane-dense output row) -----
    node_tot = node_e0 + ATOMIC_INTER_SCALE * node_inter + ATOMIC_INTER_SHIFT
    return jnp.sum(batch_oh * node_tot, axis=0, keepdims=True)   # [1, BG]


# ============================ Pallas kernel ==================================
def _energy_kernel(pos_ref, node_pack_ref, edge_pack_ref, w_embed_ae_ref,
                   wr1_ref, wr2bd_ref, w12_ref, wskip_ref, w_ro_ref,
                   energy_ref):
    energy_ref[...] = _energy_core(
        pos_ref[...], node_pack_ref[...], edge_pack_ref[...],
        w_embed_ae_ref[...], wr1_ref[...], wr2bd_ref[...], w12_ref[...],
        wskip_ref[...], w_ro_ref[...])


def make_pallas_energy(node_pack, edge_pack, weights):
    """Returns energy(positions [S,N,3]) -> [S, G] using the Pallas kernel."""
    w_embed_ae, wr1_stack, wr2_bd, w12s, wskip_all, w_ro = weights
    L, H, Z, NB, RH = (NUM_INTERACTIONS, HIDDEN, NUM_ELEMENTS, NUM_BESSEL,
                       RADIAL_HIDDEN)
    call = pl.pallas_call(
        _energy_kernel,
        grid=(N_BLOCKS,),
        out_shape=jax.ShapeDtypeStruct((N_BLOCKS, 1, BG), jnp.float32),
        in_specs=[
            pl.BlockSpec((None, BN, 3), lambda s: (s, 0, 0)),          # positions
            pl.BlockSpec((None, BN, NODE_PACK_W), lambda s: (s, 0, 0)),  # node pack
            pl.BlockSpec((None, BE, EDGE_PACK_W), lambda s: (s, 0, 0)),  # edge pack
            pl.BlockSpec((Z, H + 1), lambda s: (0, 0)),                # [w_embed|ae]
            pl.BlockSpec((NB, L * RH), lambda s: (0, 0)),              # wr1 stacked
            pl.BlockSpec((L * RH, L * SH_DIM), lambda s: (0, 0)),      # wr2 blockdiag
            pl.BlockSpec((L, 2 * H, H), lambda s: (0, 0, 0)),          # [w1;w2]
            pl.BlockSpec((Z, L * H), lambda s: (0, 0)),                # wskip stacked
            pl.BlockSpec((L, 1, H), lambda s: (0, 0, 0)),              # readouts
        ],
        out_specs=pl.BlockSpec((None, 1, BG), lambda s: (s, 0, 0)),
        compiler_params=pltpu.CompilerParams(
            dimension_semantics=("parallel",)),
    )

    def energy_fn(positions):
        pos_b = positions.reshape(N_BLOCKS, BN, 3)
        out = call(pos_b, node_pack, edge_pack, w_embed_ae, wr1_stack, wr2_bd,
                   w12s, wskip_all, w_ro)                    # [NBLK, 1, BG]
        return out.reshape(N_SYSTEMS, N_GRAPHS)

    return energy_fn


def make_mirror_energy(node_pack, edge_pack, weights):
    """Pure-JAX mirror of the kernel (same helpers) for checks / backward."""
    def energy_fn(positions):
        pos_b = positions.reshape(N_BLOCKS, BN, 3)
        f = lambda p, npk, epk: _energy_core(p, npk, epk, *weights)
        e = jax.vmap(f)(pos_b, node_pack, edge_pack)         # [NBLK, 1, BG]
        return e.reshape(N_SYSTEMS, N_GRAPHS)
    return energy_fn


# ================================ main =======================================
if __name__ == "__main__":
    key = jax.random.PRNGKey(0)
    (k_pos, k_spec, k_ae, k_emb, k_w1, k_wr1, k_wr2, k_w2, k_sk,
     k_ro) = jax.random.split(key, 10)

    S, N, E, G = N_SYSTEMS, N_NODES, N_EDGES, N_GRAPHS
    Z, H, NB, RH, L = (NUM_ELEMENTS, HIDDEN, NUM_BESSEL, RADIAL_HIDDEN,
                       NUM_INTERACTIONS)

    # --- synthetic batched atomic graphs -------------------------------------
    positions = jax.random.uniform(k_pos, (S, N, 3), jnp.float32,
                                   minval=0.0, maxval=2.0)
    species = jax.random.randint(k_spec, (S, N), 0, Z)
    node_attrs = jax.nn.one_hot(species, Z, dtype=jnp.float32)     # [S,N,Z]
    node_attrs_np = np.asarray(node_attrs)

    # each node i sends edges to (i+1)%N and (i+2)%N -> E = 16, no self loops
    sender = np.concatenate([np.arange(N), np.arange(N)])
    receiver = np.concatenate([(np.arange(N) + 1) % N,
                               (np.arange(N) + 2) % N])
    send_oh_1 = np.eye(N, dtype=np.float32)[sender]                # [E,N]
    recv_oh_1 = np.eye(N, dtype=np.float32)[receiver]              # [E,N]
    diff_oh_1 = recv_oh_1 - send_oh_1                              # [E,N]
    batch = np.array([0] * (N // 2) + [1] * (N // 2))
    batch_oh_1 = np.eye(G, dtype=np.float32)[batch]                # [N,G]

    def blkdiag(m):
        r, c = m.shape
        out = np.zeros((S_BLK * r, S_BLK * c), np.float32)
        for i in range(S_BLK):
            out[i * r:(i + 1) * r, i * c:(i + 1) * c] = m
        return out

    recv_oh_t_bd = blkdiag(recv_oh_1.T)                            # [BN,BE]
    diff_oh_bd = blkdiag(diff_oh_1)                                # [BE,BN]
    send_oh_bd = blkdiag(send_oh_1)                                # [BE,BN]
    batch_oh_bd = blkdiag(batch_oh_1)                              # [BN,BG]
    shifts_blk = np.zeros((BE, 3), np.float32)

    # host-packed static per-block operands (2 slabs instead of 6 arrays)
    node_pack = jnp.asarray(np.stack([
        np.concatenate(
            [recv_oh_t_bd,
             node_attrs_np[b * S_BLK:(b + 1) * S_BLK].reshape(BN, Z),
             batch_oh_bd], axis=1)
        for b in range(N_BLOCKS)]))                                # [NBLK,BN,40]
    edge_pack = jnp.asarray(np.broadcast_to(
        np.concatenate([diff_oh_bd, send_oh_bd, shifts_blk], axis=1),
        (N_BLOCKS, BE, EDGE_PACK_W)).copy())                       # [NBLK,BE,35]

    # --- deterministic synthetic parameters ----------------------------------
    ae = jax.random.normal(k_ae, (Z, 1), jnp.float32)
    w_embed = jax.random.normal(k_emb, (Z, H), jnp.float32)
    w1s = jax.random.normal(k_w1, (L, H, H), jnp.float32) / math.sqrt(H)
    wr1s = jax.random.normal(k_wr1, (L, NB, RH), jnp.float32) / math.sqrt(NB)
    wr2s = jax.random.normal(k_wr2, (L, RH, SH_DIM), jnp.float32) / math.sqrt(RH)
    w2s = jax.random.normal(k_w2, (L, H, H), jnp.float32) / math.sqrt(H)
    wskips = jax.random.normal(k_sk, (L, Z, H), jnp.float32) / math.sqrt(Z)
    w_ro = jax.random.normal(k_ro, (L, 1, H), jnp.float32)

    # host-side weight fusion / stacking
    w_embed_ae = jnp.concatenate([w_embed, ae], axis=1)            # [Z, H+1]
    wr1_stack = jnp.concatenate([wr1s[l] for l in range(L)], axis=1)  # [NB, L*RH]
    wr2_np = np.asarray(wr2s)
    wr2_bd_np = np.zeros((L * RH, L * SH_DIM), np.float32)
    for l in range(L):
        wr2_bd_np[l * RH:(l + 1) * RH, l * SH_DIM:(l + 1) * SH_DIM] = wr2_np[l]
    wr2_bd = jnp.asarray(wr2_bd_np)                                # [L*RH, L*SH]
    w12s = jnp.concatenate([w1s, w2s], axis=1)                     # [L, 2H, H]
    wskip_all = jnp.concatenate([wskips[l] for l in range(L)], axis=1)  # [Z, L*H]

    weights = (w_embed_ae, wr1_stack, wr2_bd, w12s, wskip_all, w_ro)

    # --- energy via the Pallas kernel ----------------------------------------
    pallas_energy = make_pallas_energy(node_pack, edge_pack, weights)
    mirror_energy = make_mirror_energy(node_pack, edge_pack, weights)

    energy = jax.block_until_ready(pallas_energy(positions))       # [S, G]

    # --- forces: kernel on the forward path, mirror VJP on the backward ------
    # TODO(synk): no Pallas backward kernel yet; bwd re-runs the pure-JAX mirror.
    @jax.custom_vjp
    def total_energy(pos):
        return jnp.sum(pallas_energy(pos))

    def _te_fwd(pos):
        return jnp.sum(pallas_energy(pos)), pos

    def _te_bwd(pos, g):
        _, vjp_fn = jax.vjp(lambda p: jnp.sum(mirror_energy(p)), pos)
        return vjp_fn(g)

    total_energy.defvjp(_te_fwd, _te_bwd)

    forces = -jax.grad(total_energy)(positions)
    forces = jax.block_until_ready(forces)

    # --- correctness vs. pure-JAX mirror --------------------------------------
    energy_ref = mirror_energy(positions)
    np.testing.assert_allclose(np.asarray(energy), np.asarray(energy_ref),
                               rtol=5e-4, atol=5e-4)
    assert energy.shape == (S, G)
    assert forces.shape == (S, N, 3)

    print("KERNEL_OK")
</pallas_src>

<mosaic_0001>
module attributes {stable_mosaic.version = 11 : i64} {
  func.func @_energy_kernel(%arg0: i32, %arg1: memref<1x16x3xf32, #tpu.memory_space<vmem>>, %arg2: memref<1x16x40xf32, #tpu.memory_space<vmem>>, %arg3: memref<1x32x35xf32, #tpu.memory_space<vmem>>, %arg4: memref<4x33xf32, #tpu.memory_space<vmem>>, %arg5: memref<8x32xf32, #tpu.memory_space<vmem>>, %arg6: memref<32x32xf32, #tpu.memory_space<vmem>>, %arg7: memref<2x64x32xf32, #tpu.memory_space<vmem>>, %arg8: memref<4x64xf32, #tpu.memory_space<vmem>>, %arg9: memref<2x1x32xf32, #tpu.memory_space<vmem>>, %arg10: memref<1x1x4xf32, #tpu.memory_space<vmem>>) attributes {dimension_semantics = [#tpu.dimension_semantics<parallel>], iteration_bounds = array<i64: 2>, scalar_prefetch = 0 : i64, scratch_operands = 0 : i64, tpu.core_type = #tpu.core_type<tc>, window_params = [{transform_indices = @transform_0, window_bounds = array<i64: 1, 16, 3>}, {transform_indices = @transform_1, window_bounds = array<i64: 1, 16, 40>}, {transform_indices = @transform_2, window_bounds = array<i64: 1, 32, 35>}, {pipeline_mode = #tpu.pipeline_mode<synchronous>, transform_indices = @transform_3, window_bounds = array<i64: 4, 33>}, {pipeline_mode = #tpu.pipeline_mode<synchronous>, transform_indices = @transform_4, window_bounds = array<i64: 8, 32>}, {pipeline_mode = #tpu.pipeline_mode<synchronous>, transform_indices = @transform_5, window_bounds = array<i64: 32, 32>}, {pipeline_mode = #tpu.pipeline_mode<synchronous>, transform_indices = @transform_6, window_bounds = array<i64: 2, 64, 32>}, {pipeline_mode = #tpu.pipeline_mode<synchronous>, transform_indices = @transform_7, window_bounds = array<i64: 4, 64>}, {pipeline_mode = #tpu.pipeline_mode<synchronous>, transform_indices = @transform_8, window_bounds = array<i64: 2, 1, 32>}, {transform_indices = @transform_9, window_bounds = array<i64: 1, 1, 4>}]} {
    %c0 = arith.constant 0 : index
    %c0_0 = arith.constant 0 : index
    %c0_1 = arith.constant 0 : index
    %0 = vector.load %arg1[%c0, %c0_0, %c0_1] : memref<1x16x3xf32, #tpu.memory_space<vmem>>, vector<1x16x3xf32>
    %1 = vector.shape_cast %0 : vector<1x16x3xf32> to vector<16x3xf32>
    %c0_2 = arith.constant 0 : index
    %c0_3 = arith.constant 0 : index
    %c0_4 = arith.constant 0 : index
    %2 = vector.load %arg2[%c0_2, %c0_3, %c0_4] : memref<1x16x40xf32, #tpu.memory_space<vmem>>, vector<1x16x40xf32>
    %3 = vector.shape_cast %2 : vector<1x16x40xf32> to vector<16x40xf32>
    %c0_5 = arith.constant 0 : index
    %c0_6 = arith.constant 0 : index
    %c0_7 = arith.constant 0 : index
    %4 = vector.load %arg3[%c0_5, %c0_6, %c0_7] : memref<1x32x35xf32, #tpu.memory_space<vmem>>, vector<1x32x35xf32>
    %5 = vector.shape_cast %4 : vector<1x32x35xf32> to vector<32x35xf32>
    %c0_8 = arith.constant 0 : index
    %c0_9 = arith.constant 0 : index
    %6 = vector.load %arg4[%c0_8, %c0_9] : memref<4x33xf32, #tpu.memory_space<vmem>>, vector<4x33xf32>
    %c0_10 = arith.constant 0 : index
    %c0_11 = arith.constant 0 : index
    %7 = vector.load %arg5[%c0_10, %c0_11] : memref<8x32xf32, #tpu.memory_space<vmem>>, vector<8x32xf32>
    %c0_12 = arith.constant 0 : index
    %c0_13 = arith.constant 0 : index
    %8 = vector.load %arg6[%c0_12, %c0_13] : memref<32x32xf32, #tpu.memory_space<vmem>>, vector<32x32xf32>
    %c0_14 = arith.constant 0 : index
    %c0_15 = arith.constant 0 : index
    %c0_16 = arith.constant 0 : index
    %9 = vector.load %arg7[%c0_14, %c0_15, %c0_16] : memref<2x64x32xf32, #tpu.memory_space<vmem>>, vector<2x64x32xf32>
    %c0_17 = arith.constant 0 : index
    %c0_18 = arith.constant 0 : index
    %10 = vector.load %arg8[%c0_17, %c0_18] : memref<4x64xf32, #tpu.memory_space<vmem>>, vector<4x64xf32>
    %c0_19 = arith.constant 0 : index
    %c0_20 = arith.constant 0 : index
    %c0_21 = arith.constant 0 : index
    %11 = vector.load %arg9[%c0_19, %c0_20, %c0_21] : memref<2x1x32xf32, #tpu.memory_space<vmem>>, vector<2x1x32xf32>
    %12 = vector.extract_strided_slice %3 {offsets = [0, 0], sizes = [16, 32], strides = [1, 1]} : vector<16x40xf32> to vector<16x32xf32>
    %13 = vector.extract_strided_slice %3 {offsets = [0, 32], sizes = [16, 4], strides = [1, 1]} : vector<16x40xf32> to vector<16x4xf32>
    %14 = vector.extract_strided_slice %3 {offsets = [0, 36], sizes = [16, 4], strides = [1, 1]} : vector<16x40xf32> to vector<16x4xf32>
    %15 = vector.extract_strided_slice %5 {offsets = [0, 0], sizes = [32, 16], strides = [1, 1]} : vector<32x35xf32> to vector<32x16xf32>
    %16 = vector.extract_strided_slice %5 {offsets = [0, 16], sizes = [32, 16], strides = [1, 1]} : vector<32x35xf32> to vector<32x16xf32>
    %17 = vector.extract_strided_slice %5 {offsets = [0, 32], sizes = [32, 3], strides = [1, 1]} : vector<32x35xf32> to vector<32x3xf32>
    %cst = arith.constant dense<0.000000e+00> : vector<32x3xf32>
    %18 = tpu.matmul %15, %1, %cst {dimension_numbers = #tpu.dot_dimension_numbers<[1], [0], [0], [1], [0, 0, 1, 1], [], []>} : vector<32x16xf32>, vector<16x3xf32>, vector<32x3xf32> -> vector<32x3xf32>
    %19 = arith.addf %18, %17 : vector<32x3xf32>
    %20 = arith.mulf %19, %19 : vector<32x3xf32>
    %cst_22 = arith.constant dense<0.000000e+00> : vector<32xf32>
    %21 = vector.multi_reduction <add>, %20, %cst_22 [1] : vector<32x3xf32> to vector<32xf32>
    %22 = vector.shape_cast %21 : vector<32xf32> to vector<32x1xf32>
    %cst_23 = arith.constant 9.99999996E-13 : f32
    %23 = vector.broadcast %cst_23 : f32 to vector<32x1xf32>
    %24 = arith.maximumf %22, %23 : vector<32x1xf32>
    %25 = math.rsqrt %24 : vector<32x1xf32>
    %26 = arith.mulf %22, %25 : vector<32x1xf32>
    %27 = vector.broadcast %25 : vector<32x1xf32> to vector<32x3xf32>
    %28 = arith.mulf %19, %27 : vector<32x3xf32>
    %29 = vector.extract_strided_slice %28 {offsets = [0, 0], sizes = [32, 1], strides = [1, 1]} : vector<32x3xf32> to vector<32x1xf32>
    %30 = vector.extract_strided_slice %28 {offsets = [0, 1], sizes = [32, 1], strides = [1, 1]} : vector<32x3xf32> to vector<32x1xf32>
    %31 = vector.extract_strided_slice %28 {offsets = [0, 2], sizes = [32, 1], strides = [1, 1]} : vector<32x3xf32> to vector<32x1xf32>
    %cst_24 = arith.constant 1.000000e+00 : f32
    %32 = vector.broadcast %cst_24 : f32 to vector<32x1xf32>
    %cst_25 = arith.constant 1.73205078 : f32
    %33 = vector.broadcast %cst_25 : f32 to vector<32x1xf32>
    %34 = arith.mulf %33, %29 : vector<32x1xf32>
    %cst_26 = arith.constant 1.73205078 : f32
    %35 = vector.broadcast %cst_26 : f32 to vector<32x1xf32>
    %36 = arith.mulf %35, %30 : vector<32x1xf32>
    %cst_27 = arith.constant 1.73205078 : f32
    %37 = vector.broadcast %cst_27 : f32 to vector<32x1xf32>
    %38 = arith.mulf %37, %31 : vector<32x1xf32>
    %cst_28 = arith.constant 3.87298346 : f32
    %39 = vector.broadcast %cst_28 : f32 to vector<32x1xf32>
    %40 = arith.mulf %39, %29 : vector<32x1xf32>
    %41 = arith.mulf %40, %30 : vector<32x1xf32>
    %cst_29 = arith.constant 3.87298346 : f32
    %42 = vector.broadcast %cst_29 : f32 to vector<32x1xf32>
    %43 = arith.mulf %42, %30 : vector<32x1xf32>
    %44 = arith.mulf %43, %31 : vector<32x1xf32>
    %cst_30 = arith.constant 3.000000e+00 : f32
    %45 = vector.broadcast %cst_30 : f32 to vector<32x1xf32>
    %46 = arith.mulf %45, %31 : vector<32x1xf32>
    %47 = arith.mulf %46, %31 : vector<32x1xf32>
    %cst_31 = arith.constant 1.000000e+00 : f32
    %48 = vector.broadcast %cst_31 : f32 to vector<32x1xf32>
    %49 = arith.subf %47, %48 : vector<32x1xf32>
    %cst_32 = arith.constant 1.11803401 : f32
    %50 = vector.broadcast %cst_32 : f32 to vector<32x1xf32>
    %51 = arith.mulf %50, %49 : vector<32x1xf32>
    %cst_33 = arith.constant 3.87298346 : f32
    %52 = vector.broadcast %cst_33 : f32 to vector<32x1xf32>
    %53 = arith.mulf %52, %29 : vector<32x1xf32>
    %54 = arith.mulf %53, %31 : vector<32x1xf32>
    %55 = arith.mulf %29, %29 : vector<32x1xf32>
    %56 = arith.mulf %30, %30 : vector<32x1xf32>
    %57 = arith.subf %55, %56 : vector<32x1xf32>
    %cst_34 = arith.constant 1.93649173 : f32
    %58 = vector.broadcast %cst_34 : f32 to vector<32x1xf32>
    %59 = arith.mulf %58, %57 : vector<32x1xf32>
    %cst_35 = arith.constant 2.091650e+00 : f32
    %60 = vector.broadcast %cst_35 : f32 to vector<32x1xf32>
    %61 = arith.mulf %60, %30 : vector<32x1xf32>
    %cst_36 = arith.constant 3.000000e+00 : f32
    %62 = vector.broadcast %cst_36 : f32 to vector<32x1xf32>
    %63 = arith.mulf %62, %29 : vector<32x1xf32>
    %64 = arith.mulf %63, %29 : vector<32x1xf32>
    %65 = arith.mulf %30, %30 : vector<32x1xf32>
    %66 = arith.subf %64, %65 : vector<32x1xf32>
    %67 = arith.mulf %61, %66 : vector<32x1xf32>
    %cst_37 = arith.constant 10.2469511 : f32
    %68 = vector.broadcast %cst_37 : f32 to vector<32x1xf32>
    %69 = arith.mulf %68, %29 : vector<32x1xf32>
    %70 = arith.mulf %69, %30 : vector<32x1xf32>
    %71 = arith.mulf %70, %31 : vector<32x1xf32>
    %cst_38 = arith.constant 1.62018514 : f32
    %72 = vector.broadcast %cst_38 : f32 to vector<32x1xf32>
    %73 = arith.mulf %72, %30 : vector<32x1xf32>
    %cst_39 = arith.constant 5.000000e+00 : f32
    %74 = vector.broadcast %cst_39 : f32 to vector<32x1xf32>
    %75 = arith.mulf %74, %31 : vector<32x1xf32>
    %76 = arith.mulf %75, %31 : vector<32x1xf32>
    %cst_40 = arith.constant 1.000000e+00 : f32
    %77 = vector.broadcast %cst_40 : f32 to vector<32x1xf32>
    %78 = arith.subf %76, %77 : vector<32x1xf32>
    %79 = arith.mulf %73, %78 : vector<32x1xf32>
    %cst_41 = arith.constant 1.32287562 : f32
    %80 = vector.broadcast %cst_41 : f32 to vector<32x1xf32>
    %81 = arith.mulf %80, %31 : vector<32x1xf32>
    %cst_42 = arith.constant 5.000000e+00 : f32
    %82 = vector.broadcast %cst_42 : f32 to vector<32x1xf32>
    %83 = arith.mulf %82, %31 : vector<32x1xf32>
    %84 = arith.mulf %83, %31 : vector<32x1xf32>
    %cst_43 = arith.constant 3.000000e+00 : f32
    %85 = vector.broadcast %cst_43 : f32 to vector<32x1xf32>
    %86 = arith.subf %84, %85 : vector<32x1xf32>
    %87 = arith.mulf %81, %86 : vector<32x1xf32>
    %cst_44 = arith.constant 1.62018514 : f32
    %88 = vector.broadcast %cst_44 : f32 to vector<32x1xf32>
    %89 = arith.mulf %88, %29 : vector<32x1xf32>
    %cst_45 = arith.constant 5.000000e+00 : f32
    %90 = vector.broadcast %cst_45 : f32 to vector<32x1xf32>
    %91 = arith.mulf %90, %31 : vector<32x1xf32>
    %92 = arith.mulf %91, %31 : vector<32x1xf32>
    %cst_46 = arith.constant 1.000000e+00 : f32
    %93 = vector.broadcast %cst_46 : f32 to vector<32x1xf32>
    %94 = arith.subf %92, %93 : vector<32x1xf32>
    %95 = arith.mulf %89, %94 : vector<32x1xf32>
    %cst_47 = arith.constant 5.12347555 : f32
    %96 = vector.broadcast %cst_47 : f32 to vector<32x1xf32>
    %97 = arith.mulf %96, %31 : vector<32x1xf32>
    %98 = arith.mulf %29, %29 : vector<32x1xf32>
    %99 = arith.mulf %30, %30 : vector<32x1xf32>
    %100 = arith.subf %98, %99 : vector<32x1xf32>
    %101 = arith.mulf %97, %100 : vector<32x1xf32>
    %cst_48 = arith.constant 2.091650e+00 : f32
    %102 = vector.broadcast %cst_48 : f32 to vector<32x1xf32>
    %103 = arith.mulf %102, %29 : vector<32x1xf32>
    %104 = arith.mulf %29, %29 : vector<32x1xf32>
    %cst_49 = arith.constant 3.000000e+00 : f32
    %105 = vector.broadcast %cst_49 : f32 to vector<32x1xf32>
    %106 = arith.mulf %105, %30 : vector<32x1xf32>
    %107 = arith.mulf %106, %30 : vector<32x1xf32>
    %108 = arith.subf %104, %107 : vector<32x1xf32>
    %109 = arith.mulf %103, %108 : vector<32x1xf32>
    %110 = tpu.concatenate %32, %34, %36, %38, %41, %44, %51, %54, %59, %67, %71, %79, %87, %95, %101, %109 in 1 : vector<32x1xf32>, vector<32x1xf32>, vector<32x1xf32>, vector<32x1xf32>, vector<32x1xf32>, vector<32x1xf32>, vector<32x1xf32>, vector<32x1xf32>, vector<32x1xf32>, vector<32x1xf32>, vector<32x1xf32>, vector<32x1xf32>, vector<32x1xf32>, vector<32x1xf32>, vector<32x1xf32>, vector<32x1xf32> -> vector<32x16xf32>
    %111 = tpu.iota {dimensions = array<i32: 1>} : vector<1x8xi32>
    %112 = arith.sitofp %111 : vector<1x8xi32> to vector<1x8xf32>
    %cst_50 = arith.constant 1.000000e+00 : f32
    %113 = vector.broadcast %cst_50 : f32 to vector<1x8xf32>
    %114 = arith.addf %112, %113 : vector<1x8xf32>
    %cst_51 = arith.constant 0.628318548 : f32
    %115 = vector.broadcast %cst_51 : f32 to vector<1x8xf32>
    %116 = arith.mulf %115, %114 : vector<1x8xf32>
    %117 = vector.broadcast %26 : vector<32x1xf32> to vector<32x8xf32>
    %118 = vector.broadcast %116 : vector<1x8xf32> to vector<32x8xf32>
    %119 = arith.mulf %117, %118 : vector<32x8xf32>
    %120 = math.sin %119 : vector<32x8xf32>
    %cst_52 = arith.constant 0.632455527 : f32
    %121 = vector.broadcast %cst_52 : f32 to vector<32x8xf32>
    %122 = arith.mulf %121, %120 : vector<32x8xf32>
    %123 = vector.broadcast %25 : vector<32x1xf32> to vector<32x8xf32>
    %124 = arith.mulf %122, %123 : vector<32x8xf32>
    %cst_53 = arith.constant 2.000000e-01 : f32
    %125 = vector.broadcast %cst_53 : f32 to vector<32x1xf32>
    %126 = arith.mulf %26, %125 : vector<32x1xf32>
    %127 = arith.mulf %126, %126 : vector<32x1xf32>
    %128 = arith.mulf %127, %127 : vector<32x1xf32>
    %129 = arith.mulf %128, %127 : vector<32x1xf32>
    %130 = arith.mulf %129, %126 : vector<32x1xf32>
    %131 = arith.mulf %130, %126 : vector<32x1xf32>
    %cst_54 = arith.constant 2.800000e+01 : f32
    %132 = vector.broadcast %cst_54 : f32 to vector<32x1xf32>
    %133 = arith.mulf %132, %129 : vector<32x1xf32>
    %cst_55 = arith.constant 1.000000e+00 : f32
    %134 = vector.broadcast %cst_55 : f32 to vector<32x1xf32>
    %135 = arith.subf %134, %133 : vector<32x1xf32>
    %cst_56 = arith.constant 4.800000e+01 : f32
    %136 = vector.broadcast %cst_56 : f32 to vector<32x1xf32>
    %137 = arith.mulf %136, %130 : vector<32x1xf32>
    %138 = arith.addf %135, %137 : vector<32x1xf32>
    %cst_57 = arith.constant 2.100000e+01 : f32
    %139 = vector.broadcast %cst_57 : f32 to vector<32x1xf32>
    %140 = arith.mulf %139, %131 : vector<32x1xf32>
    %141 = arith.subf %138, %140 : vector<32x1xf32>
    %cst_58 = arith.constant 1.000000e+00 : f32
    %142 = vector.broadcast %cst_58 : f32 to vector<32x1xf32>
    %143 = arith.cmpf olt, %126, %142 : vector<32x1xf32>
    %144 = arith.extui %143 : vector<32x1xi1> to vector<32x1xi32>
    %145 = arith.sitofp %144 : vector<32x1xi32> to vector<32x1xf32>
    %146 = arith.mulf %141, %145 : vector<32x1xf32>
    %147 = vector.broadcast %146 : vector<32x1xf32> to vector<32x8xf32>
    %148 = arith.mulf %124, %147 : vector<32x8xf32>
    %cst_59 = arith.constant dense<0.000000e+00> : vector<16x33xf32>
    %149 = tpu.matmul %13, %6, %cst_59 {dimension_numbers = #tpu.dot_dimension_numbers<[1], [0], [0], [1], [0, 0, 1, 1], [], []>} : vector<16x4xf32>, vector<4x33xf32>, vector<16x33xf32> -> vector<16x33xf32>
    %150 = vector.extract_strided_slice %149 {offsets = [0, 0], sizes = [16, 32], strides = [1, 1]} : vector<16x33xf32> to vector<16x32xf32>
    %cst_60 = arith.constant 5.000000e-01 : f32
    %151 = vector.broadcast %cst_60 : f32 to vector<16x32xf32>
    %152 = arith.mulf %150, %151 : vector<16x32xf32>
    %153 = vector.extract_strided_slice %149 {offsets = [0, 32], sizes = [16, 1], strides = [1, 1]} : vector<16x33xf32> to vector<16x1xf32>
    %cst_61 = arith.constant dense<0.000000e+00> : vector<32x32xf32>
    %154 = tpu.matmul %148, %7, %cst_61 {dimension_numbers = #tpu.dot_dimension_numbers<[1], [0], [0], [1], [0, 0, 1, 1], [], []>} : vector<32x8xf32>, vector<8x32xf32>, vector<32x32xf32> -> vector<32x32xf32>
    %155 = arith.negf %154 : vector<32x32xf32>
    %156 = math.exp %155 : vector<32x32xf32>
    %cst_62 = arith.constant 1.000000e+00 : f32
    %157 = vector.broadcast %cst_62 : f32 to vector<32x32xf32>
    %158 = arith.addf %157, %156 : vector<32x32xf32>
    %159 = arith.divf %157, %158 : vector<32x32xf32>
    %160 = arith.mulf %154, %159 : vector<32x32xf32>
    %cst_63 = arith.constant dense<0.000000e+00> : vector<32x32xf32>
    %161 = tpu.matmul %160, %8, %cst_63 {dimension_numbers = #tpu.dot_dimension_numbers<[1], [0], [0], [1], [0, 0, 1, 1], [], []>} : vector<32x32xf32>, vector<32x32xf32>, vector<32x32xf32> -> vector<32x32xf32>
    %162 = vector.extract_strided_slice %161 {offsets = [0, 0], sizes = [32, 16], strides = [1, 1]} : vector<32x32xf32> to vector<32x16xf32>
    %163 = arith.mulf %110, %162 : vector<32x16xf32>
    %cst_64 = arith.constant dense<0.000000e+00> : vector<32xf32>
    %164 = vector.multi_reduction <add>, %163, %cst_64 [1] : vector<32x16xf32> to vector<32xf32>
    %165 = vector.shape_cast %164 : vector<32xf32> to vector<32x1xf32>
    %166 = vector.extract_strided_slice %161 {offsets = [0, 16], sizes = [32, 16], strides = [1, 1]} : vector<32x32xf32> to vector<32x16xf32>
    %167 = arith.mulf %110, %166 : vector<32x16xf32>
    %cst_65 = arith.constant dense<0.000000e+00> : vector<32xf32>
    %168 = vector.multi_reduction <add>, %167, %cst_65 [1] : vector<32x16xf32> to vector<32xf32>
    %169 = vector.shape_cast %168 : vector<32xf32> to vector<32x1xf32>
    %cst_66 = arith.constant dense<0.000000e+00> : vector<16x64xf32>
    %170 = tpu.matmul %13, %10, %cst_66 {dimension_numbers = #tpu.dot_dimension_numbers<[1], [0], [0], [1], [0, 0, 1, 1], [], []>} : vector<16x4xf32>, vector<4x64xf32>, vector<16x64xf32> -> vector<16x64xf32>
    %cst_67 = arith.constant 0.000000e+00 : f32
    %171 = vector.broadcast %cst_67 : f32 to vector<16x1xf32>
    %172 = vector.extract_strided_slice %9 {offsets = [0, 0, 0], sizes = [1, 32, 32], strides = [1, 1, 1]} : vector<2x64x32xf32> to vector<1x32x32xf32>
    %173 = vector.shape_cast %172 : vector<1x32x32xf32> to vector<32x32xf32>
    %174 = vector.extract_strided_slice %9 {offsets = [0, 32, 0], sizes = [1, 32, 32], strides = [1, 1, 1]} : vector<2x64x32xf32> to vector<1x32x32xf32>
    %175 = vector.shape_cast %174 : vector<1x32x32xf32> to vector<32x32xf32>
    %cst_68 = arith.constant dense<0.000000e+00> : vector<16x32xf32>
    %176 = tpu.matmul %152, %173, %cst_68 {dimension_numbers = #tpu.dot_dimension_numbers<[1], [0], [0], [1], [0, 0, 1, 1], [], []>} : vector<16x32xf32>, vector<32x32xf32>, vector<16x32xf32> -> vector<16x32xf32>
    %cst_69 = arith.constant dense<0.000000e+00> : vector<32x32xf32>
    %177 = tpu.matmul %16, %176, %cst_69 {dimension_numbers = #tpu.dot_dimension_numbers<[1], [0], [0], [1], [0, 0, 1, 1], [], []>} : vector<32x16xf32>, vector<16x32xf32>, vector<32x32xf32> -> vector<32x32xf32>
    %178 = vector.broadcast %165 : vector<32x1xf32> to vector<32x32xf32>
    %179 = arith.mulf %177, %178 : vector<32x32xf32>
    %cst_70 = arith.constant dense<0.000000e+00> : vector<16x32xf32>
    %180 = tpu.matmul %12, %179, %cst_70 {dimension_numbers = #tpu.dot_dimension_numbers<[1], [0], [0], [1], [0, 0, 1, 1], [], []>} : vector<16x32xf32>, vector<32x32xf32>, vector<16x32xf32> -> vector<16x32xf32>
    %cst_71 = arith.constant 2.500000e-01 : f32
    %181 = vector.broadcast %cst_71 : f32 to vector<16x32xf32>
    %182 = arith.mulf %180, %181 : vector<16x32xf32>
    %cst_72 = arith.constant dense<0.000000e+00> : vector<16x32xf32>
    %183 = tpu.matmul %182, %175, %cst_72 {dimension_numbers = #tpu.dot_dimension_numbers<[1], [0], [0], [1], [0, 0, 1, 1], [], []>} : vector<16x32xf32>, vector<32x32xf32>, vector<16x32xf32> -> vector<16x32xf32>
    %184 = vector.extract_strided_slice %170 {offsets = [0, 0], sizes = [16, 32], strides = [1, 1]} : vector<16x64xf32> to vector<16x32xf32>
    %185 = arith.addf %183, %184 : vector<16x32xf32>
    %186 = vector.extract_strided_slice %11 {offsets = [0, 0, 0], sizes = [1, 1, 32], strides = [1, 1, 1]} : vector<2x1x32xf32> to vector<1x1x32xf32>
    %187 = vector.shape_cast %186 : vector<1x1x32xf32> to vector<1x32xf32>
    %188 = vector.broadcast %187 : vector<1x32xf32> to vector<16x32xf32>
    %189 = arith.mulf %185, %188 : vector<16x32xf32>
    %cst_73 = arith.constant dense<0.000000e+00> : vector<16xf32>
    %190 = vector.multi_reduction <add>, %189, %cst_73 [1] : vector<16x32xf32> to vector<16xf32>
    %191 = vector.shape_cast %190 : vector<16xf32> to vector<16x1xf32>
    %cst_74 = arith.constant 0.176776692 : f32
    %192 = vector.broadcast %cst_74 : f32 to vector<16x1xf32>
    %193 = arith.mulf %191, %192 : vector<16x1xf32>
    %194 = arith.addf %171, %193 : vector<16x1xf32>
    %195 = vector.extract_strided_slice %9 {offsets = [1, 0, 0], sizes = [1, 32, 32], strides = [1, 1, 1]} : vector<2x64x32xf32> to vector<1x32x32xf32>
    %196 = vector.shape_cast %195 : vector<1x32x32xf32> to vector<32x32xf32>
    %197 = vector.extract_strided_slice %9 {offsets = [1, 32, 0], sizes = [1, 32, 32], strides = [1, 1, 1]} : vector<2x64x32xf32> to vector<1x32x32xf32>
    %198 = vector.shape_cast %197 : vector<1x32x32xf32> to vector<32x32xf32>
    %cst_75 = arith.constant dense<0.000000e+00> : vector<16x32xf32>
    %199 = tpu.matmul %185, %196, %cst_75 {dimension_numbers = #tpu.dot_dimension_numbers<[1], [0], [0], [1], [0, 0, 1, 1], [], []>} : vector<16x32xf32>, vector<32x32xf32>, vector<16x32xf32> -> vector<16x32xf32>
    %cst_76 = arith.constant dense<0.000000e+00> : vector<32x32xf32>
    %200 = tpu.matmul %16, %199, %cst_76 {dimension_numbers = #tpu.dot_dimension_numbers<[1], [0], [0], [1], [0, 0, 1, 1], [], []>} : vector<32x16xf32>, vector<16x32xf32>, vector<32x32xf32> -> vector<32x32xf32>
    %201 = vector.broadcast %169 : vector<32x1xf32> to vector<32x32xf32>
    %202 = arith.mulf %200, %201 : vector<32x32xf32>
    %cst_77 = arith.constant dense<0.000000e+00> : vector<16x32xf32>
    %203 = tpu.matmul %12, %202, %cst_77 {dimension_numbers = #tpu.dot_dimension_numbers<[1], [0], [0], [1], [0, 0, 1, 1], [], []>} : vector<16x32xf32>, vector<32x32xf32>, vector<16x32xf32> -> vector<16x32xf32>
    %cst_78 = arith.constant 2.500000e-01 : f32
    %204 = vector.broadcast %cst_78 : f32 to vector<16x32xf32>
    %205 = arith.mulf %203, %204 : vector<16x32xf32>
    %cst_79 = arith.constant dense<0.000000e+00> : vector<16x32xf32>
    %206 = tpu.matmul %205, %198, %cst_79 {dimension_numbers = #tpu.dot_dimension_numbers<[1], [0], [0], [1], [0, 0, 1, 1], [], []>} : vector<16x32xf32>, vector<32x32xf32>, vector<16x32xf32> -> vector<16x32xf32>
    %207 = vector.extract_strided_slice %170 {offsets = [0, 32], sizes = [16, 32], strides = [1, 1]} : vector<16x64xf32> to vector<16x32xf32>
    %208 = arith.addf %206, %207 : vector<16x32xf32>
    %209 = vector.extract_strided_slice %11 {offsets = [1, 0, 0], sizes = [1, 1, 32], strides = [1, 1, 1]} : vector<2x1x32xf32> to vector<1x1x32xf32>
    %210 = vector.shape_cast %209 : vector<1x1x32xf32> to vector<1x32xf32>
    %211 = vector.broadcast %210 : vector<1x32xf32> to vector<16x32xf32>
    %212 = arith.mulf %208, %211 : vector<16x32xf32>
    %cst_80 = arith.constant dense<0.000000e+00> : vector<16xf32>
    %213 = vector.multi_reduction <add>, %212, %cst_80 [1] : vector<16x32xf32> to vector<16xf32>
    %214 = vector.shape_cast %213 : vector<16xf32> to vector<16x1xf32>
    %cst_81 = arith.constant 0.176776692 : f32
    %215 = vector.broadcast %cst_81 : f32 to vector<16x1xf32>
    %216 = arith.mulf %214, %215 : vector<16x1xf32>
    %217 = arith.addf %194, %216 : vector<16x1xf32>
    %cst_82 = arith.constant 1.300000e+00 : f32
    %218 = vector.broadcast %cst_82 : f32 to vector<16x1xf32>
    %219 = arith.mulf %218, %217 : vector<16x1xf32>
    %220 = arith.addf %153, %219 : vector<16x1xf32>
    %cst_83 = arith.constant 1.000000e-01 : f32
    %221 = vector.broadcast %cst_83 : f32 to vector<16x1xf32>
    %222 = arith.addf %220, %221 : vector<16x1xf32>
    %223 = vector.broadcast %222 : vector<16x1xf32> to vector<16x4xf32>
    %224 = arith.mulf %14, %223 : vector<16x4xf32>
    %cst_84 = arith.constant dense<0.000000e+00> : vector<4xf32>
    %225 = vector.multi_reduction <add>, %224, %cst_84 [0] : vector<16x4xf32> to vector<4xf32>
    %226 = vector.shape_cast %225 : vector<4xf32> to vector<1x4xf32>
    %c0_85 = arith.constant 0 : index
    %c0_86 = arith.constant 0 : index
    %c0_87 = arith.constant 0 : index
    %227 = vector.load %arg10[%c0_85, %c0_86, %c0_87] : memref<1x1x4xf32, #tpu.memory_space<vmem>>, vector<1x1x4xf32>
    %228 = vector.shape_cast %227 : vector<1x1x4xf32> to vector<1x4xf32>
    %229 = vector.shape_cast %226 : vector<1x4xf32> to vector<1x1x4xf32>
    tpu.vector_store %arg10[%c0_85, %c0_86, %c0_87], %229 {strides = array<i32>} : memref<1x1x4xf32, #tpu.memory_space<vmem>>, vector<1x1x4xf32>,
    return
  }
  func.func @transform_0(%arg0: i32) -> (i32, i32, i32) {
    %c0_i32 = arith.constant 0 : i32
    %c0_i32_0 = arith.constant 0 : i32
    %c0_i32_1 = arith.constant 0 : i32
    return %arg0, %c0_i32, %c0_i32_0 : i32, i32, i32
  }
  func.func @transform_1(%arg0: i32) -> (i32, i32, i32) {
    %c0_i32 = arith.constant 0 : i32
    %c0_i32_0 = arith.constant 0 : i32
    %c0_i32_1 = arith.constant 0 : i32
    return %arg0, %c0_i32, %c0_i32_0 : i32, i32, i32
  }
  func.func @transform_2(%arg0: i32) -> (i32, i32, i32) {
    %c0_i32 = arith.constant 0 : i32
    %c0_i32_0 = arith.constant 0 : i32
    %c0_i32_1 = arith.constant 0 : i32
    return %arg0, %c0_i32, %c0_i32_0 : i32, i32, i32
  }
  func.func @transform_3(%arg0: i32) -> (i32, i32) {
    %c0_i32 = arith.constant 0 : i32
    %c0_i32_0 = arith.constant 0 : i32
    %c0_i32_1 = arith.constant 0 : i32
    return %c0_i32, %c0_i32_0 : i32, i32
  }
  func.func @transform_4(%arg0: i32) -> (i32, i32) {
    %c0_i32 = arith.constant 0 : i32
    %c0_i32_0 = arith.constant 0 : i32
    %c0_i32_1 = arith.constant 0 : i32
    return %c0_i32, %c0_i32_0 : i32, i32
  }
  func.func @transform_5(%arg0: i32) -> (i32, i32) {
    %c0_i32 = arith.constant 0 : i32
    %c0_i32_0 = arith.constant 0 : i32
    %c0_i32_1 = arith.constant 0 : i32
    return %c0_i32, %c0_i32_0 : i32, i32
  }
  func.func @transform_6(%arg0: i32) -> (i32, i32, i32) {
    %c0_i32 = arith.constant 0 : i32
    %c0_i32_0 = arith.constant 0 : i32
    %c0_i32_1 = arith.constant 0 : i32
    %c0_i32_2 = arith.constant 0 : i32
    return %c0_i32, %c0_i32_0, %c0_i32_1 : i32, i32, i32
  }
  func.func @transform_7(%arg0: i32) -> (i32, i32) {
    %c0_i32 = arith.constant 0 : i32
    %c0_i32_0 = arith.constant 0 : i32
    %c0_i32_1 = arith.constant 0 : i32
    return %c0_i32, %c0_i32_0 : i32, i32
  }
  func.func @transform_8(%arg0: i32) -> (i32, i32, i32) {
    %c0_i32 = arith.constant 0 : i32
    %c0_i32_0 = arith.constant 0 : i32
    %c0_i32_1 = arith.constant 0 : i32
    %c0_i32_2 = arith.constant 0 : i32
    return %c0_i32, %c0_i32_0, %c0_i32_1 : i32, i32, i32
  }
  func.func @transform_9(%arg0: i32) -> (i32, i32, i32) {
    %c0_i32 = arith.constant 0 : i32
    %c0_i32_0 = arith.constant 0 : i32
    %c0_i32_1 = arith.constant 0 : i32
    return %arg0, %c0_i32, %c0_i32_0 : i32, i32, i32
  }
}

</mosaic_0001>

<bundles_post_ra>
// kernel: tpu_custom_call.1
= control target key start
LH: loop header
LB: loop body
LE: loop exit
PB: predicated region body
PF: predicated region fallthrough
CT: control target
= control target key end

     0   :  { %14 = vsyncpa [#allocation3], 0  ;;  %s4127_s0 = inlined_call_operand.vmem [shape: f32[2,16,3], index: 0, kind: input, shape index: {}]   ;;  %s4128_s1 = inlined_call_operand.vmem [shape: f32[2,16,40], index: 1, kind: input, shape index: {}]   ;;  %s4129_s2 = inlined_call_operand.vmem [shape: f32[2,32,35], index: 2, kind: input, shape index: {}]   ;;  %s4130_s3 = inlined_call_operand.vmem [shape: f32[4,33], index: 3, kind: input, shape index: {}]   ;;  %s4131_s4 = inlined_call_operand.vmem [shape: f32[8,32], index: 4, kind: input, shape index: {}]   ;;  %s4132_s5 = inlined_call_operand.vmem [shape: f32[32,32], index: 5, kind: input, shape index: {}]   ;;  %s4133_s6 = inlined_call_operand.vmem [shape: f32[2,64,32], index: 6, kind: input, shape index: {}]   ;;  %s4134_s7 = inlined_call_operand.vmem [shape: f32[4,64], index: 7, kind: input, shape index: {}]   ;;  %s4135_s8 = inlined_call_operand.vmem [shape: f32[2,1,32], index: 8, kind: input, shape index: {}]   ;;  %s4136_s9 = inlined_call_operand.hbm [shape: f32[2,1,4], index: 9, kind: output, shape index: {}]  }
   0x1   :  { %16 = vsyncpa [#allocation3 + $0x1], 0  ;;  %s2746_s30 = smov 0   ;;  %s2748_s10 = smov 0  }
   0x2   :  { %s2750_s11 = smov 0   ;;  %s2752_s12 = smov 0  }
   0x3 LB: > { %s2767_s13 = sadd.s32 4294967295, %s2671_s12   ;;  %s2429_s14 = sadd.s32 4294967294, %s2671_s12   ;;  %s2671_s12 = sphi %s2752_s12, %s4219_s12   ;;  %s2667_s11 = sphi %s2750_s11, %s4218_s11   ;;  %s2663_s10 = sphi %s2748_s10, %s4217_s10   ;;  %s2659_s30 = sphi %s2746_s30, %s4216_s30  }
   0x4   : > { %s2771_s15 = sadd.s32 1, %s2671_s12   ;;  %s233_s16 = sadd.s32 1, %s2667_s11 }
   0x5   : > { %s230_s17 = ssub.s32 %s2671_s12, %s2771_s15  ;;  %p243_p0 = scmp.ne.s32.totalorder %s2667_s11, %s2663_s10 }
   0x6   : > { %p231_p1 = scmp.eq.s32.totalorder %s230_s17, 0  ;;  %p244_p2 = scmp.eq.s32.totalorder %s2767_s13, 1 }
   0x7   : > { %p249_p3 = scmp.ne.s32.totalorder %s2663_s10, %s2659_s30  ;;  %p250_p4 = scmp.eq.s32.totalorder %s2429_s14, 1 }
   0x8   : > { %s2782_s18 = scalar_select %p231_p1, %s2667_s11, %s233_s16  }
   0x9   : > { %p2784_p5 = por %p244_p2, %p243_p0  ;;  %p2788_p6 = por %p250_p4, %p249_p3 }
   0xa   : > { %p2432_p7 = scmp.ge.s32.totalorder %s2671_s12, 1  ;;  %p310_p8 = scmp.lt.s32.totalorder %s2671_s12, 3 }
   0xc   : > { %p311_p9 = pnand %p2432_p7, %p310_p8 }
   0xe   : > { %314 = sbr.rel (%p311_p9) target bundleno = 2120 (0x848), region = 56 }
  0x13   : > { %p355_p10 = scmp.lt.s32.totalorder %s2767_s13, 1  ;;  %vm419_vm0 = vcmask 130048   ;;  %s2673_s14 = smov 96   ;;  %vm461_vm1 = vcmask 23552   ;;  %v1032_v30 = vlaneseq }
  0x14   : > { %s2674_s24 = smov 112   ;;  %s2684_s27 = smov 1  }
  0x15   : > { %s2796_s21 = scalar_select %p355_p10, %s2767_s13, 1  ;;  %v1033_v32 = vand.u32 127, %v1032_v30  ;;  %v4140_v30 = vmov 920167782  }
  0x16   : > { %s2685_s28 = smov 4   ;;  %s2688_s17 = smov 8  }
  0x17   : > { %s2511_s22 = sshll.u32 %s2796_s21, 4  ;;  %s2513_s23 = sshll.u32 %s2796_s21, 5  ;;  %v1034_v36 = vcvt.s32.f32 %v1033_v32 }
  0x18   : > { %s359_s26 = scalar_lea.vmem %s4127_s0, %s2511_s22  ;;  %s369_s29 = scalar_lea.vmem %s4129_s2, %s2513_s23 }
  0x19   : > { %v371_v0 = vld [vmem:[%s359_s26 + $0x8] sm:$0xff]  ;;  %v370_v1 = vld [vmem:[%s359_s26] sm:$0xff]  ;;  %v377_v3 = vld [vmem:[%s369_s29 + $0x18] sm:$0xff]  ;;  %s2837_s23 = scalar_lea.vmem %s4128_s1, %s2511_s22  ;;  %v1035_v41 = vadd.f32 1.0, %v1034_v36  ;;  %s2675_s21 = smov 126  }
  0x1a   : > { %442 = vmatpush.msra.mxu0 %v371_v0  ;;  %2514 = vmatpush.msra.mxu2 %v371_v0  ;;  %v374_v2 = vld [vmem:[%s369_s29] sm:$0xff]  ;;  %v376_v4 = vld [vmem:[%s369_s29 + $0x10] sm:$0xff]  ;;  %v375_v5 = vld [vmem:[%s369_s29 + $0x8] sm:$0xff]  ;;  %s2676_s22 = smov 127   ;;  %s2686_s29 = smov 10  }
  0x1b   : > { %407 = vrot.lane.b32.xlu0 %v374_v2, %s2673_s14  ;;  %411 = vrot.lane.b32.xlu1 %v376_v4, %s2673_s14  ;;  %v372_v26 = vld [vmem:[%s2837_s23] sm:$0xff]  ;;  %v373_v27 = vld [vmem:[%s2837_s23 + $0x8] sm:$0xff]  ;;  %v2852_v47 = vmul.f32 0.62831855, %v1035_v41  ;;  %s2690_s16 = smov 7   ;;  %s2691_s25 = smov 13  }
  0x1c   : > { %443 = vmatpush.msra.mxu0 %v370_v1  ;;  %2515 = vmatpush.msra.mxu2 %v370_v1 }
  0x1d   : > { %2439 = vmatmul.msk.f32.vlgmr.msra.gmra.mxu0 %vm419_vm0, %v374_v2  ;;  %2442 = vmatmul.msk.f32.vlgmr.msra.gmra.mxu2 %vm419_vm0, %v377_v3 }
  0x23   : > { %409 = vrot.lane.b32.xlu0 %v375_v5, %s2673_s14  ;;  %413 = vrot.lane.b32.xlu1 %v377_v3, %s2673_s14 }
  0x25   : > { %2440 = vmatmul.msk.f32.gmra.mxu0 %vm419_vm0, %v375_v5 }
  0x2d   : > { %2441 = vmatmul.msk.f32.gmra.mxu0 %vm419_vm0, %v376_v4 }
  0x8d   : > { %v412_v6 = vpop.permute.xlu1 %411  ;;  %v408_v7 = vpop.permute.xlu0 %407 }
  0x95   : > { %v414_v11 = vpop.permute.xlu1 %413  ;;  %v410_v14 = vpop.permute.xlu0 %409 }
  0x9a   : > { %v445_v8 = vpop.f32.mrf.mxu0 }
  0x9b   : > { %v446_v9 = vadd.f32 %v445_v8, %v408_v7 }
  0x9d   : > { %v457_v10 = vmul.f32 %v446_v9, %v446_v9 }
  0x9f   : > { %v462_v12 = vsel %vm461_vm1, %v457_v10, 0.0 }
  0xa0   : > { %v454_v13 = vpop.f32.mrf.mxu2  ;;  %463 = vadd.xlane.f32.xlu2 %v462_v12 }
  0xa1   : > { %v2817_v15 = vadd.f32 %v454_v13, %v414_v11 }
  0xa2   : > { %v448_v16 = vpop.f32.mrf.mxu0 }
  0xa3   : > { %v2819_v17 = vadd.f32 %v448_v16, %v410_v14  ;;  %v460_v18 = vmul.f32 %v2817_v15, %v2817_v15  ;;  %v4145_v16 = vmov 683565275  }
  0xa5   : > { %v471_v19 = vsel %vm461_vm1, %v460_v18, 0.0  ;;  %v458_v20 = vmul.f32 %v2819_v17, %v2819_v17 }
  0xa6   : > { %472 = vadd.xlane.f32.xlu1 %v471_v19  ;;  %v2678_v19 = vmov 2475754826  }
  0xa7   : > { %v465_v21 = vsel %vm461_vm1, %v458_v20, 0.0 }
  0xa8   : > { %466 = vadd.xlane.f32.xlu2 %v465_v21  ;;  %v2679_v21 = vmov 2131351028  }
  0xaa   : > { %v451_v22 = vpop.f32.mrf.mxu0 }
  0xab   : > { %v2827_v23 = vadd.f32 %v451_v22, %v412_v6 }
  0xad   : > { %v459_v24 = vmul.f32 %v2827_v23, %v2827_v23 }
  0xaf   : > { %v468_v25 = vsel %vm461_vm1, %v459_v24, 0.0 }
  0xb0   : > { %469 = vadd.xlane.f32.xlu0 %v468_v25 }
  0xc0   : > { %1739 = vrot.lane.b32.xlu2 %v372_v26, %s2673_s14 }
  0xc4   : > { %2046 = vrot.lane.b32.xlu0 %v376_v4, %s2674_s24 }
  0xc8   : > { %1741 = vrot.lane.b32.xlu2 %v373_v27, %s2673_s14  ;;  %v4142_v27 = vmov 2102212464  }
  0xd0   : > { %2042 = vrot.lane.b32.xlu2 %v374_v2, %s2674_s24 }
  0xd8   : > { %2044 = vrot.lane.b32.xlu2 %v375_v5, %s2674_s24 }
  0xe0   : > { %2048 = vrot.lane.b32.xlu2 %v377_v3, %s2674_s24 }
 0x113   : > { %v464_v28 = vpop.xlane.xlu2 %463 }
 0x114   : > { %v474_v29 = vmax.f32 %v464_v28, 1e-12 }
 0x116   : > { %2583 = vrsqrt.f32 %v474_v29  ;;  %vm484_vm3 = vweird.f32 %v474_v29 }
 0x119   : > { %v473_v31 = vpop.xlane.xlu1 %472 }
 0x11a   : > { %v477_v33 = vmax.f32 %v473_v31, 1e-12 }
 0x11b   : > { %v2847_v38 = vpop.xlane.xlu2 %466 }
 0x11c   : > { %v2584_v34 = vpop.eup %2583  ;;  %2585 = vrsqrt.f32 %v477_v33  ;;  %v2850_v42 = vmax.f32 %v2847_v38, 1e-12  ;;  %vm514_vm5 = vweird.f32 %v477_v33 }
 0x11d   : > { %v479_v35 = vmul.f32 %v2584_v34, %v474_v29  ;;  %vm485_vm2 = vweird.f32 %v2584_v34 }
 0x11e   : > { %vm486_vm4 = vmor %vm484_vm3, %vm485_vm2  ;;  %2587 = vrsqrt.f32 %v2850_v42 }
 0x11f   : > { %v480_v37 = vmul.f32 %v2584_v34, %v479_v35 }
 0x121   : > { %v481_v39 = vmul.f32 0.5, %v480_v37 }
 0x122   : > { %v2586_v40 = vpop.eup %2585 }
 0x123   : > { %v482_v43 = vsub.f32 1.5, %v481_v39  ;;  %v509_v44 = vmul.f32 %v2586_v40, %v477_v33  ;;  %vm515_vm6 = vweird.f32 %v2586_v40  ;;  %v4139_v33 = vmov 1326507024  }
 0x124   : > { %v2871_v55 = vpop.eup %2587  ;;  %vm516_vm7 = vmor %vm514_vm5, %vm515_vm6  ;;  %vm494_vm5 = vweird.f32 %v2850_v42 }
 0x125   : > { %v483_v45 = vmul.f32 %v2584_v34, %v482_v43  ;;  %v510_v46 = vmul.f32 %v2586_v40, %v509_v44  ;;  %v489_v62 = vmul.f32 %v2871_v55, %v2850_v42  ;;  %vm495_vm3 = vweird.f32 %v2871_v55 }
 0x127   : > { %v2855_v48 = vsel %vm486_vm4, %v2584_v34, %v483_v45  ;;  %v511_v49 = vmul.f32 0.5, %v510_v46  ;;  %v490_v7 = vmul.f32 %v2871_v55, %v489_v62 }
 0x128   : > { %v2858_v50 = vmul.f32 %v2855_v48, %v464_v28  ;;  %v2861_v51 = vmul.f32 %v2855_v48, %v446_v9 }
 0x129   : > { %v512_v52 = vsub.f32 1.5, %v511_v49 }
 0x12a   : > { %4169 = vst [vmem:[#allocation5_spill] sm:$0xff] %v2861_v51  ;;  %v2865_v53 = vmul.f32 %v2852_v47, %v2858_v50  ;;  %570 = vrot.lane.b32.xlu0 %v2861_v51, %s2675_s21  ;;  %538 = vrot.lane.b32.xlu1 %v2861_v51, %s2676_s22 }
 0x12b   : > { %v513_v54 = vmul.f32 %v2586_v40, %v512_v52 }
 0x12c   : > { %v1041_v56 = vand.u32 2147483647, %v2865_v53  ;;  %v1044_v57 = vand.u32 2139095040, %v2865_v53 }
 0x12d   : > { %v2875_v58 = vsel %vm516_vm7, %v2586_v40, %v513_v54 }
 0x12e   : > { %4170 = vst [vmem:[#allocation6_spill] sm:$0xff] %v2875_v58  ;;  %v1045_v59 = vshrl.u32 %v1044_v57, 23  ;;  %v1048_v60 = vand.u32 8388607, %v1041_v56  ;;  %v2880_v61 = vmul.f32 %v2875_v58, %v473_v31  ;;  %v2886_v1 = vmul.f32 %v2875_v58, %v2817_v15 }
 0x12f   : > { %v2904_v15 = vmul.f32 0.5, %v490_v7 }
 0x130   : > { %v2455_v63 = vadd.s32 4294967169, %v1045_v59  ;;  %v1049_v0 = vor.u32 8388608, %v1048_v60  ;;  %v2890_v2 = vmul.f32 %v2852_v47, %v2880_v61 }
 0x132   : > { %v1051_v3 = vadd.s32 1, %v2455_v63  ;;  %544 = vrot.lane.b32.xlu1 %v2886_v1, %s2676_s22  ;;  %v1509_v4 = vand.u32 2139095040, %v2890_v2  ;;  %v2895_v5 = vshll.u32 %v1049_v0, 8  ;;  %v4137_v6 = vand.u32 2147483647, %v2890_v2 }
 0x134   : > { %vm1052_vm8 = vcmp.gt.s32.totalorder %v1051_v3, 0  ;;  %v1510_v9 = vshrl.u32 %v1509_v4, 23  ;;  %v1090_v13 = vand.u32 65535, %v2895_v5  ;;  %v2902_v14 = vand.u32 8388607, %v4137_v6 }
 0x135   : > { %v1053_v8 = vsel %vm1052_vm8, %v1051_v3, 0  ;;  %v1091_v0 = vshrl.u32 %v2895_v5, 16 }
 0x136   : > { %v1055_v10 = vand.u32 31, %v1053_v8  ;;  %v1054_v11 = vshrl.u32 %v1053_v8, 5  ;;  %v2464_v24 = vadd.s32 4294967169, %v1510_v9 }
 0x138   : > { %v1056_v12 = vsub.s32 32, %v1055_v10  ;;  %v1058_v18 = vshll.u32 %v4145_v16, %v1055_v10  ;;  %v1061_v20 = vshll.u32 %v2678_v19, %v1055_v10  ;;  %v1064_v22 = vshll.u32 %v2679_v21, %v1055_v10 }
 0x139   : > { %v1067_v29 = vshll.u32 %v4142_v27, %v1055_v10  ;;  %v1070_v32 = vshll.u32 %v4140_v30, %v1055_v10  ;;  %vm1073_vm9 = vcmp.lt.s32.totalorder %v1054_v11, 1  ;;  %vm1074_vm10 = vcmp.lt.s32.totalorder %v1054_v11, 2 }
 0x13a   : > { %v1059_v25 = vshrl.u32 %v2678_v19, %v1056_v12  ;;  %v1062_v26 = vshrl.u32 %v2679_v21, %v1056_v12  ;;  %v1065_v28 = vshrl.u32 %v4142_v27, %v1056_v12  ;;  %v1068_v31 = vshrl.u32 %v4140_v30, %v1056_v12 }
 0x13b   : > { %v1071_v34 = vshrl.u32 %v4139_v33, %v1056_v12  ;;  %vm1076_vm11 = vcmp.lt.s32.totalorder %v1054_v11, 4  ;;  %v1516_v41 = vadd.s32 1, %v2464_v24  ;;  %v1057_v43 = vshrl.u32 %v4145_v16, %v1056_v12 }
 0x13c   : > { %v1060_v35 = vor.u32 %v1059_v25, %v1058_v18  ;;  %v1063_v36 = vor.u32 %v1062_v26, %v1061_v20  ;;  %v1066_v37 = vor.u32 %v1065_v28, %v1064_v22  ;;  %v1069_v39 = vor.u32 %v1068_v31, %v1067_v29 }
 0x13d   : > { %v1072_v40 = vor.u32 %v1071_v34, %v1070_v32  ;;  %vm1075_vm12 = vcmp.lt.s32.totalorder %v1054_v11, 3  ;;  %vm1517_vm13 = vcmp.gt.s32.totalorder %v1516_v41, 0  ;;  %v1514_v12 = vor.u32 8388608, %v2902_v14 }
 0x13e   : > { %v1078_v44 = vsel %vm1076_vm11, %v1066_v37, 2102212464  ;;  %v1081_v45 = vsel %vm1073_vm9, %v1060_v35, %v1063_v36  ;;  %v1085_v46 = vsel %vm1073_vm9, %v1063_v36, %v1066_v37  ;;  %v1082_v49 = vsel %vm1076_vm11, %v1069_v39, 920167782 }
 0x13f   : > { %v1086_v52 = vsel %vm1076_vm11, %v1072_v40, 1326507024  ;;  %v1077_v54 = vsel %vm1073_vm9, %v1057_v43, %v1060_v35  ;;  %v1079_v57 = vsel %vm1075_vm12, %v1063_v36, %v1078_v44  ;;  %v1083_v59 = vsel %vm1075_vm12, %v1066_v37, %v1082_v49  ;;  %vm496_vm11 = vmor %vm494_vm5, %vm495_vm3 }
 0x140   : > { %v1087_v60 = vsel %vm1075_vm12, %v1069_v39, %v1086_v52  ;;  %v1084_v62 = vsel %vm1074_vm10, %v1081_v45, %v1083_v59  ;;  %v1518_v3 = vsel %vm1517_vm13, %v1516_v41, 0  ;;  %v2924_v10 = vsel %vm1074_vm10, %v1077_v54, %v1079_v57 }
 0x141   : > { %v1088_v63 = vsel %vm1074_vm10, %v1085_v46, %v1087_v60  ;;  %v1114_v8 = vand.u32 65535, %v1084_v62  ;;  %v1115_v9 = vshrl.u32 %v1084_v62, 16  ;;  %v492_v18 = vsub.f32 1.5, %v2904_v15 }
 0x142   : > { %v1092_v4 = vand.u32 65535, %v1088_v63  ;;  %v1093_v7 = vshrl.u32 %v1088_v63, 16  ;;  %v2928_v24 = vshrl.u32 %v1518_v3, 5  ;;  %v1520_v25 = vand.u32 31, %v1518_v3 }
 0x143   : > { %v1117_v29 = vmul.u32 %v1115_v9, %v1090_v13  ;;  %v1118_v31 = vmul.u32 %v1114_v8, %v1091_v0  ;;  %v1116_v35 = vmul.u32 %v1114_v8, %v1090_v13  ;;  %v1119_v36 = vmul.u32 %v1115_v9, %v1091_v0 }
 0x144   : > { %v1095_v20 = vmul.u32 %v1093_v7, %v1090_v13  ;;  %v1096_v22 = vmul.u32 %v1092_v4, %v1091_v0  ;;  %v1094_v26 = vmul.u32 %v1092_v4, %v1090_v13  ;;  %v1097_v28 = vmul.u32 %v1093_v7, %v1091_v0 }
 0x145   : > { %v1120_v39 = vshll.u32 %v1117_v29, 16  ;;  %v1121_v40 = vshrl.u32 %v1117_v29, 16  ;;  %v1122_v43 = vshll.u32 %v1118_v31, 16  ;;  %v2930_v44 = vsub.s32 32, %v1520_v25 }
 0x146   : > { %v1098_v32 = vshll.u32 %v1095_v20, 16  ;;  %v1099_v34 = vshrl.u32 %v1095_v20, 16  ;;  %v1100_v11 = vshll.u32 %v1096_v22, 16  ;;  %v1101_v37 = vshrl.u32 %v1096_v22, 16 }
 0x147   : > { %v4146_v45 = vmov 0   ;;  %v1123_v49 = vshrl.u32 %v1118_v31, 16  ;;  %vm1124_vm15 = vc.u32 %v1116_v35, %v1120_v39  ;;  %v1126_v52 = vadd.s32 %v1120_v39, %v1116_v35 }
 0x148   : > { %vm1102_vm14 = vc.u32 %v1094_v26, %v1098_v32  ;;  %v1104_v41 = vadd.s32 %v1098_v32, %v1094_v26  ;;  %v1125_v13 = vsel %vm1124_vm15, 1, %v4146_v45  ;;  %v1523_v57 = vshll.u32 %v4145_v16, %v1520_v25 }
 0x149   : > { %v1103_v46 = vsel %vm1102_vm14, 1, %v4146_v45  ;;  %v1127_v60 = vadd.s32 %v1125_v13, %v1119_v36  ;;  %vm1128_vm4 = vc.u32 %v1126_v52, %v1122_v43  ;;  %v1526_v62 = vshll.u32 %v2678_v19, %v1520_v25 }
 0x14a   : > { %v1105_v54 = vadd.s32 %v1103_v46, %v1097_v28  ;;  %vm1106_vm2 = vc.u32 %v1104_v41, %v1100_v11  ;;  %v1129_v0 = vsel %vm1128_vm4, 1, %v4146_v45  ;;  %v1524_v3 = vshrl.u32 %v2678_v19, %v2930_v44 }
 0x14b   : > { %v1107_v59 = vsel %vm1106_vm2, 1, %v4146_v45  ;;  %v1527_v4 = vshrl.u32 %v2679_v21, %v2930_v44  ;;  %v1131_v7 = vadd.s32 %v1129_v0, %v1127_v60  ;;  %v1529_v8 = vshll.u32 %v2679_v21, %v1520_v25 }
 0x14c   : > { %v1109_v63 = vadd.s32 %v1107_v59, %v1105_v54  ;;  %v1530_v9 = vshrl.u32 %v4142_v27, %v2930_v44  ;;  %v1532_v20 = vshll.u32 %v4142_v27, %v1520_v25  ;;  %v2948_v26 = vor.u32 %v1524_v3, %v1523_v57 }
 0x14d   : > { %v2950_v28 = vor.u32 %v1527_v4, %v1526_v62  ;;  %v1533_v29 = vshrl.u32 %v4140_v30, %v2930_v44  ;;  %v1132_v31 = vadd.s32 %v1131_v7, %v1121_v40  ;;  %v1535_v35 = vshll.u32 %v4140_v30, %v1520_v25 }
 0x14e   : > { %v1110_v22 = vadd.s32 %v1109_v63, %v1099_v34  ;;  %v2954_v32 = vor.u32 %v1530_v9, %v1529_v8  ;;  %v1536_v36 = vshrl.u32 %v4139_v33, %v2930_v44  ;;  %v2961_v39 = vadd.s32 %v1126_v52, %v1122_v43 }
 0x14f   : > { %v1534_v34 = vor.u32 %v1533_v29, %v1532_v20  ;;  %vm1538_vm6 = vcmp.lt.s32.totalorder %v2928_v24, 1  ;;  %v1133_v41 = vadd.s32 %v1132_v31, %v1123_v49  ;;  %vm1541_vm7 = vcmp.lt.s32.totalorder %v2928_v24, 4 }
 0x150   : > { %v2959_v11 = vadd.s32 %v1110_v22, %v1101_v37  ;;  %v1537_v46 = vor.u32 %v1536_v36, %v1535_v35  ;;  %v1546_v40 = vsel %vm1538_vm6, %v2948_v26, %v2950_v28  ;;  %vm1540_vm9 = vcmp.lt.s32.totalorder %v2928_v24, 3 }
 0x151   : > { %v1547_v25 = vsel %vm1541_vm7, %v1534_v34, 920167782  ;;  %v493_v37 = vmul.f32 %v2871_v55, %v492_v18  ;;  %v1137_v43 = vadd.s32 1, %v1133_v41  ;;  %vm1539_vm10 = vcmp.lt.s32.totalorder %v2928_v24, 2 }
 0x152   : > { %vm1136_vm8 = vc.u32 %v2959_v11, %v2961_v39  ;;  %v1548_v49 = vsel %vm1540_vm9, %v2954_v32, %v1547_v25  ;;  %v1550_v52 = vsel %vm1538_vm6, %v2950_v28, %v2954_v32  ;;  %v1134_v54 = vmul.u32 %v2895_v5, %v2924_v10 }
 0x153   : > { %v1549_v15 = vsel %vm1539_vm10, %v1546_v40, %v1548_v49  ;;  %v1551_v18 = vsel %vm1541_vm7, %v1537_v46, 1326507024  ;;  %v2993_v13 = vshll.u32 %v1514_v12, 8  ;;  %v1138_v57 = vsel %vm1136_vm8, %v1137_v43, %v1133_v41 }
 0x154   : > { %v1552_v59 = vsel %vm1540_vm9, %v1534_v34, %v1551_v18  ;;  %v1580_v60 = vshrl.u32 %v1549_v15, 16  ;;  %v1139_v5 = vadd.s32 %v1138_v57, %v1134_v54  ;;  %v3005_v14 = vsel %vm496_vm11, %v2871_v55, %v493_v37 }
 0x155   : > { %v1553_v10 = vsel %vm1539_vm10, %v1550_v52, %v1552_v59  ;;  %v1555_v62 = vand.u32 65535, %v2993_v13  ;;  %4171 = vst [vmem:[#allocation7_spill] sm:$0xff] %v3005_v14  ;;  %v1556_v12 = vshrl.u32 %v2993_v13, 16  ;;  %v1579_v3 = vand.u32 65535, %v1549_v15 }
 0x156   : > { %v1557_v63 = vand.u32 65535, %v1553_v10  ;;  %v1558_v0 = vshrl.u32 %v1553_v10, 16  ;;  %v1140_v4 = vadd.s32 536870912, %v1139_v5  ;;  %v3012_v22 = vmul.f32 %v3005_v14, %v2847_v38 }
 0x157   : > { %v1582_v7 = vmul.u32 %v1580_v60, %v1555_v62  ;;  %v1581_v55 = vmul.u32 %v1579_v3, %v1555_v62  ;;  %v1583_v35 = vmul.u32 %v1579_v3, %v1556_v12  ;;  %v1584_v46 = vmul.u32 %v1580_v60, %v1556_v12 }
 0x158   : > { %v1560_v8 = vmul.u32 %v1558_v0, %v1555_v62  ;;  %v1561_v9 = vmul.u32 %v1557_v63, %v1556_v12  ;;  %v3008_v42 = vshrl.u32 %v1140_v4, 30  ;;  %v1559_v29 = vmul.u32 %v1557_v63, %v1555_v62 }
 0x159   : > { %v1585_v20 = vshll.u32 %v1582_v7, 16  ;;  %v1562_v34 = vmul.u32 %v1558_v0, %v1556_v12  ;;  %v3019_v38 = vmul.f32 %v2852_v47, %v3012_v22  ;;  %v1587_v54 = vshll.u32 %v1583_v35, 16 }
 0x15a   : > { %v1563_v31 = vshll.u32 %v1560_v8, 16  ;;  %v1142_v36 = vshll.u32 %v3008_v42, 30  ;;  %v1565_v41 = vshll.u32 %v1561_v9, 16  ;;  %v1564_v59 = vshrl.u32 %v1560_v8, 16 }
 0x15b   : > { %vm1589_vm13 = vc.u32 %v1581_v55, %v1585_v20  ;;  %v1591_v25 = vadd.s32 %v1585_v20, %v1581_v55  ;;  %v1566_v10 = vshrl.u32 %v1561_v9, 16  ;;  %v1586_v62 = vshrl.u32 %v1582_v7, 16 }
 0x15c   : > { %vm1567_vm12 = vc.u32 %v1559_v29, %v1563_v31  ;;  %v1569_v40 = vadd.s32 %v1563_v31, %v1559_v29  ;;  %v1143_v37 = vsub.s32 %v1139_v5, %v1142_v36  ;;  %v1590_v49 = vsel %vm1589_vm13, 1, %v4146_v45 }
 0x15d   : > { %v1568_v43 = vsel %vm1567_vm12, 1, %v4146_v45  ;;  %v1592_v15 = vadd.s32 %v1590_v49, %v1584_v46  ;;  %vm1593_vm2 = vc.u32 %v1591_v25, %v1587_v54  ;;  %v1199_v4 = vand.u32 2139095040, %v3019_v38 }
 0x15e   : > { %v1570_v52 = vadd.s32 %v1568_v43, %v1562_v34  ;;  %vm1571_vm14 = vc.u32 %v1569_v40, %v1565_v41  ;;  %vm1144_vm15 = vcmp.lt.s32.totalorder %v1143_v37, 0  ;;  %v1145_v18 = vsub.s32 0, %v1143_v37  ;;  %v3041_v40 = vpop.permute.xlu2 %1739 }
 0x15f   : > { %v1572_v57 = vsel %vm1571_vm14, 1, %v4146_v45  ;;  %v1594_v12 = vsel %vm1593_vm2, 1, %v4146_v45  ;;  %v1522_v20 = vshrl.u32 %v4145_v16, %v2930_v44  ;;  %v1543_v29 = vsel %vm1541_vm7, %v2954_v32, 2102212464 }
 0x160   : > { %v1574_v60 = vadd.s32 %v1572_v57, %v1570_v52  ;;  %v1146_v5 = vsel %vm1144_vm15, %v1145_v18, %v1143_v37  ;;  %v1596_v3 = vadd.s32 %v1594_v12, %v1592_v15  ;;  %v1588_v8 = vshrl.u32 %v1583_v35, 16 }
 0x161   : > { %v1147_v63 = vclz %v1146_v5  ;;  %v1200_v7 = vshrl.u32 %v1199_v4, 23  ;;  %v1542_v36 = vsel %vm1538_vm6, %v1522_v20, %v2948_v26  ;;  %v3034_v34 = vadd.s32 %v1591_v25, %v1587_v54 }
 0x162   : > { %v1575_v0 = vadd.s32 %v1574_v60, %v1564_v59  ;;  %v1597_v9 = vadd.s32 %v1596_v3, %v1586_v62  ;;  %v1135_v44 = vadd.s32 %v2961_v39, %v2959_v11  ;;  %v1544_v32 = vsel %vm1540_vm9, %v2950_v28, %v1543_v29  ;;  %v378_v60 = vld [vmem:[%s4130_s3] sm:$0xf] }
 0x163   : > { %v2456_v31 = vadd.s32 4294967294, %v1147_v63  ;;  %v2458_v35 = vadd.s32 4294967169, %v1200_v7  ;;  %v1545_v11 = vsel %vm1539_vm10, %v1542_v36, %v1544_v32  ;;  %v4138_v18 = vand.u32 2147483647, %v3019_v38 }
 0x164   : > { %v3029_v55 = vadd.s32 %v1575_v0, %v1566_v10  ;;  %v1598_v41 = vadd.s32 %v1597_v9, %v1588_v8  ;;  %vm1747_vm6 = vcmask 1043456   ;;  %v1599_v5 = vmul.u32 %v2993_v13, %v1545_v11 }
 0x165   : > { %vm2457_vm3 = vcmp.lt.s32.totalorder %v2456_v31, 0  ;;  %v1206_v25 = vadd.s32 1, %v2458_v35  ;;  %2471 = vmatpush.msk.msra.mxu1 %vm1747_vm6, %v378_v60  ;;  %2516 = vmatpush.msk.msra.mxu3 %vm1747_vm6, %v378_v60  ;;  %vm972_vm7 = vcmask 31744   ;;  %v3056_v10 = vmul.f32 %v2861_v51, %v2861_v51 }
 0x166   : > { %v1150_v46 = vsel %vm2457_vm3, 0, %v2456_v31  ;;  %vm1601_vm4 = vc.u32 %v3029_v55, %v3034_v34  ;;  %v1602_v26 = vadd.s32 1, %v1598_v41  ;;  %v1203_v12 = vand.u32 8388607, %v4138_v18  ;;  %2472 = vmatmul.msk.f32.vlgmr.msra.gmra.mxu1 %vm972_vm7, %v3041_v40  ;;  %v3064_v13 = vpop.permute.xlu2 %1741 }
 0x167   : > { %v1151_v43 = vsub.s32 32, %v1150_v46  ;;  %v1155_v49 = vsub.s32 4294967266, %v1150_v46  ;;  %v1152_v52 = vshll.u32 %v1143_v37, %v1150_v46  ;;  %vm1207_vm5 = vcmp.gt.s32.totalorder %v1206_v25, 0  ;;  %4172 = vst [vmem:[#allocation8_spill] sm:$0xff] %v3056_v10  ;;  %594 = vrot.lane.b32.xlu2 %v3056_v10, %s2676_s22  ;;  %2473 = vmatmul.msk.f32.vlgmr.msra.gmra.mxu3 %vm972_vm7, %v3064_v13 }
 0x168   : > { %v1603_v39 = vsel %vm1601_vm4, %v1602_v26, %v1598_v41  ;;  %v1208_v59 = vsel %vm1207_vm5, %v1206_v25, 0  ;;  %vm1043_vm12 = vcmp.lt.s32.totalorder %v2865_v53, 0  ;;  %vm3135_vm13 = vcmp.le.f32.partialorder %v1041_v56, 0.7853982 }
 0x169   : > { %v1153_v54 = vshrl.u32 %v1135_v44, %v1151_v43  ;;  %v1156_v15 = vadd.s32 127, %v1155_v49  ;;  %v1210_v37 = vand.u32 31, %v1208_v59  ;;  %v1604_v62 = vadd.s32 %v1603_v39, %v1599_v5 }
 0x16a   : > { %v3066_v4 = vshrl.u32 %v1208_v59, 5 }
 0x16b   : > { %v1154_v28 = vor.u32 %v1153_v54, %v1152_v52  ;;  %v1157_v57 = vshll.u32 %v1156_v15, 23  ;;  %v3060_v63 = vsub.s32 32, %v1210_v37  ;;  %v1213_v20 = vshll.u32 %v4145_v16, %v1210_v37 }
 0x16c   : > { %v1216_v8 = vshll.u32 %v2678_v19, %v1210_v37  ;;  %v1219_v9 = vshll.u32 %v2679_v21, %v1210_v37  ;;  %v1222_v36 = vshll.u32 %v4142_v27, %v1210_v37  ;;  %v1225_v32 = vshll.u32 %v4140_v30, %v1210_v37  ;;  %v3115_v37 = vpop.xlane.xlu0 %469 }
 0x16d   : > { %v1158_v24 = vor.u32 4788187, %v1157_v57  ;;  %v1161_v3 = vcvt.s32.f32 %v1154_v28  ;;  %v1214_v29 = vshrl.u32 %v2678_v19, %v3060_v63  ;;  %v1217_v31 = vshrl.u32 %v2679_v21, %v3060_v63 }
 0x16e   : > { %v1220_v7 = vshrl.u32 %v4142_v27, %v3060_v63  ;;  %v1223_v41 = vshrl.u32 %v4140_v30, %v3060_v63  ;;  %v1226_v44 = vshrl.u32 %v4139_v33, %v3060_v63  ;;  %v1605_v25 = vadd.s32 536870912, %v1604_v62 }
 0x16f   : > { %v1159_v0 = vand.u32 2147483647, %v1158_v24  ;;  %v3087_v35 = vor.u32 %v1214_v29, %v1213_v20  ;;  %v3089_v43 = vor.u32 %v1217_v31, %v1216_v8  ;;  %v1204_v52 = vor.u32 8388608, %v1203_v12 }
 0x170   : > { %v3091_v49 = vor.u32 %v1220_v7, %v1219_v9  ;;  %v1224_v26 = vor.u32 %v1223_v41, %v1222_v36  ;;  %v1227_v54 = vor.u32 %v1226_v44, %v1225_v32  ;;  %vm1231_vm8 = vcmp.lt.s32.totalorder %v3066_v4, 4 }
 0x171   : > { %v1162_v46 = vmul.f32 %v1161_v3, %v1159_v0  ;;  %vm1228_vm9 = vcmp.lt.s32.totalorder %v3066_v4, 1  ;;  %vm1230_vm10 = vcmp.lt.s32.totalorder %v3066_v4, 3  ;;  %v3105_v57 = vshrl.u32 %v1605_v25, 30 }
 0x172   : > { %v1237_v15 = vsel %vm1231_vm8, %v1224_v26, 920167782  ;;  %v1236_v39 = vsel %vm1228_vm9, %v3087_v35, %v3089_v43  ;;  %v1240_v59 = vsel %vm1228_vm9, %v3089_v43, %v3091_v49  ;;  %v1241_v60 = vsel %vm1231_vm8, %v1227_v54, 1326507024 }
 0x173   : > { %v1163_v11 = vxor.u32 2147483648, %v1162_v46  ;;  %v1238_v28 = vsel %vm1230_vm10, %v3091_v49, %v1237_v15  ;;  %4173 = vst [vmem:[#allocation9_spill] sm:$0xff] %v3105_v57  ;;  %v3113_v5 = vshll.u32 %v1204_v52, 8  ;;  %vm1229_vm11 = vcmp.lt.s32.totalorder %v3066_v4, 2 }
 0x174   : > { %v1242_v24 = vsel %vm1230_vm10, %v1224_v26, %v1241_v60  ;;  %v1239_v12 = vsel %vm1229_vm11, %v1236_v39, %v1238_v28  ;;  %v3128_v29 = vmax.f32 %v3115_v37, 1e-12  ;;  %v1607_v8 = vshll.u32 %v3105_v57, 30 }
 0x175   : > { %v1243_v0 = vsel %vm1229_vm11, %v1240_v59, %v1242_v24  ;;  %v1164_v3 = vsel %vm1043_vm12, %v1163_v11, %v1162_v46  ;;  %v1245_v31 = vand.u32 65535, %v3113_v5  ;;  %v1246_v9 = vshrl.u32 %v3113_v5, 16 }
 0x176   : > { %v1247_v20 = vand.u32 65535, %v1243_v0  ;;  %v1248_v7 = vshrl.u32 %v1243_v0, 16  ;;  %v1270_v41 = vshrl.u32 %v1239_v12, 16  ;;  %v3142_v44 = vsel %vm3135_vm13, %v2865_v53, %v1164_v3 }
 0x177   : > { %2589 = vrsqrt.f32 %v3128_v29  ;;  %v3145_v26 = vsub.s32 %v1604_v62, %v1607_v8  ;;  %v1269_v54 = vand.u32 65535, %v1239_v12  ;;  %v3149_v56 = vmul.f32 %v3142_v44, %v3142_v44 }
 0x178   : > { %v1250_v46 = vmul.u32 %v1248_v7, %v1245_v31  ;;  %v1251_v32 = vmul.u32 %v1247_v20, %v1246_v9  ;;  %v1249_v25 = vmul.u32 %v1247_v20, %v1245_v31  ;;  %v3152_v15 = vmul.f32 0.2, %v2858_v50 }
 0x179   : > { %v1272_v11 = vmul.u32 %v1270_v41, %v1245_v31  ;;  %v1252_v39 = vmul.u32 %v1248_v7, %v1246_v9  ;;  %v1610_v62 = vsub.s32 0, %v3145_v26  ;;  %v1273_v0 = vmul.u32 %v1269_v54, %v1246_v9 }
 0x17a   : > { %v1253_v52 = vshll.u32 %v1250_v46, 16  ;;  %v1255_v28 = vshll.u32 %v1251_v32, 16  ;;  %vm1609_vm2 = vcmp.lt.s32.totalorder %v3145_v26, 0  ;;  %v1271_v20 = vmul.u32 %v1269_v54, %v1245_v31 }
 0x17b   : > { %v1275_v50 = vshll.u32 %v1272_v11, 16  ;;  %v1177_v8 = vmul.f32 -0.00019511016, %v3149_v56  ;;  %v1673_v7 = vmul.f32 %v3152_v15, %v3152_v15  ;;  %v1254_v6 = vshrl.u32 %v1250_v46, 16 }
 0x17c   : > { %vm1257_vm14 = vc.u32 %v1249_v25, %v1253_v52  ;;  %v1259_v59 = vadd.s32 %v1253_v52, %v1249_v25  ;;  %v1212_v52 = vshrl.u32 %v4145_v16, %v3060_v63  ;;  %v1170_v31 = vmul.f32 -0.001358992, %v3149_v56 }
 0x17d   : > { %v1258_v60 = vsel %vm1257_vm14, 1, %v4146_v45  ;;  %v2590_v12 = vpop.eup %2589  ;;  %vm1279_vm3 = vc.u32 %v1271_v20, %v1275_v50  ;;  %v1281_v18 = vadd.s32 %v1275_v50, %v1271_v20  ;;  %v1178_v27 = vadd.f32 0.008332121, %v1177_v8 }
 0x17e   : > { %v1260_v24 = vadd.s32 %v1258_v60, %v1252_v39  ;;  %vm1261_vm15 = vc.u32 %v1259_v59, %v1255_v28  ;;  %v1274_v39 = vmul.u32 %v1270_v41, %v1246_v9  ;;  %v1611_v28 = vsel %vm1609_vm2, %v1610_v62, %v3145_v26 }
 0x17f   : > { %v1262_v3 = vsel %vm1261_vm15, 1, %v4146_v45  ;;  %v1277_v59 = vshll.u32 %v1273_v0, 16  ;;  %v1280_v60 = vsel %vm1279_vm3, 1, %v4146_v45  ;;  %v499_v30 = vmul.f32 %v2590_v12, %v3128_v29 }
 0x180   : > { %v1264_v25 = vadd.s32 %v1262_v3, %v1260_v24  ;;  %v1282_v33 = vadd.s32 %v1280_v60, %v1274_v39  ;;  %v1677_v24 = vmul.f32 %v1673_v7, %v1673_v7  ;;  %v1233_v63 = vsel %vm1231_vm8, %v3091_v49, 2102212464 }
 0x181   : > { %vm1283_vm4 = vc.u32 %v1281_v18, %v1277_v59  ;;  %v1232_v9 = vsel %vm1228_vm9, %v1212_v52, %v3087_v35  ;;  %v1256_v41 = vshrl.u32 %v1251_v32, 16  ;;  %v500_v62 = vmul.f32 %v2590_v12, %v499_v30 }
 0x182   : > { %v1265_v54 = vadd.s32 %v1264_v25, %v1254_v6  ;;  %v1284_v46 = vsel %vm1283_vm4, 1, %v4146_v45  ;;  %v1612_v3 = vclz %v1611_v28  ;;  %v1276_v6 = vshrl.u32 %v1272_v11, 16 }
 0x183   : > { %v1286_v20 = vadd.s32 %v1284_v46, %v1282_v33  ;;  %v526_v50 = vmul.f32 1.7320508, %v2861_v51  ;;  %v1171_v8 = vadd.f32 0.041655596, %v1170_v31  ;;  %v1234_v25 = vsel %vm1230_vm10, %v3089_v43, %v1233_v63 }
 0x184   : > { %v3178_v49 = vadd.s32 %v1265_v54, %v1256_v41  ;;  %v501_v39 = vmul.f32 0.5, %v500_v62  ;;  %v1179_v60 = vmul.f32 %v1178_v27, %v3149_v56  ;;  %v1278_v35 = vshrl.u32 %v1273_v0, 16 }
 0x185   : > { %v1287_v32 = vadd.s32 %v1286_v20, %v1276_v6  ;;  %770 = vrot.lane.b32.xlu0 %v526_v50, %s2684_s27  ;;  %v554_v30 = vmul.f32 3.0, %v2861_v51  ;;  %v3183_v33 = vadd.s32 %v1281_v18, %v1277_v59  ;;  %vm505_vm5 = vweird.f32 %v2590_v12 }
 0x186   : > { %v502_v11 = vsub.f32 1.5, %v501_v39  ;;  %v658_v52 = vmul.f32 5.0, %v2861_v51  ;;  %v1165_v43 = vsub.s32 4, %v3008_v42  ;;  %v1235_v28 = vsel %vm1229_vm11, %v1232_v9, %v1234_v25 }
 0x187   : > { %v1288_v31 = vadd.s32 %v1287_v32, %v1278_v35  ;;  %v3190_v27 = vmul.f32 %v554_v30, %v2861_v51  ;;  %vm1291_vm8 = vc.u32 %v3178_v49, %v3183_v33  ;;  %vm504_vm9 = vweird.f32 %v3128_v29 }
 0x188   : > { %v503_v0 = vmul.f32 %v2590_v12, %v502_v11  ;;  %v3196_v18 = vmul.f32 %v658_v52, %v2861_v51  ;;  %v1172_v59 = vmul.f32 %v1171_v8, %v3149_v56  ;;  %v1180_v54 = vadd.f32 -0.16666654, %v1179_v60  ;;  %vm506_vm10 = vmor %vm504_vm9, %vm505_vm5 }
 0x189   : > { %4176 = vst [vmem:[#allocation10_spill] sm:$0xff] %v3190_v27  ;;  %v1292_v63 = vadd.s32 1, %v1288_v31  ;;  %746 = vrot.lane.b32.xlu2 %v3190_v27, %s2676_s22  ;;  %v2465_v4 = vadd.s32 4294967294, %v1612_v3  ;;  %v1289_v9 = vmul.u32 %v3113_v5, %v1235_v28  ;;  %v1166_v6 = vsel %vm1043_vm12, %v1165_v43, %v3008_v42 }
 0x18a   : > { %v3202_v41 = vsel %vm506_vm10, %v2590_v12, %v503_v0  ;;  %v2447_v46 = vadd.f32 -1.0, %v3196_v18  ;;  %v1681_v20 = vmul.f32 %v1677_v24, %v1673_v7  ;;  %v1173_v3 = vadd.f32 -0.4999988, %v1172_v59 }
 0x18b   : > { %4177 = vst [vmem:[#allocation11_spill] sm:$0xff] %v3202_v41  ;;  %v1293_v62 = vsel %vm1291_vm8, %v1292_v63, %v1288_v31  ;;  %v3207_v29 = vmul.f32 %v3202_v41, %v3115_v37  ;;  %v1181_v5 = vmul.f32 %v1180_v54, %v3149_v56  ;;  %vm2466_vm11 = vcmp.lt.s32.totalorder %v2465_v4, 0 }
 0x18c   : > { %v1294_v50 = vadd.s32 %v1293_v62, %v1289_v9  ;;  %674 = vrot.lane.b32.xlu1 %v2447_v46, %s2676_s22  ;;  %v1168_v8 = vsel %vm3135_vm13, 0, %v1166_v6  ;;  %v1685_v7 = vmul.f32 %v1681_v20, %v3152_v15  ;;  %v1174_v25 = vmul.f32 %v1173_v3, %v3149_v56 }
 0x18d   : > { %v3216_v12 = vmul.f32 %v2852_v47, %v3207_v29  ;;  %702 = vrot.lane.b32.xlu0 %v2447_v46, %s2675_s21  ;;  %v1182_v39 = vadd.f32 1.0, %v1181_v5  ;;  %v3226_v60 = vsel %vm2466_vm11, 0, %v2465_v4  ;;  %v1185_v35 = vadd.s32 3, %v1168_v8 }
 0x18e   : > { %v1295_v37 = vadd.s32 536870912, %v1294_v50  ;;  %v3233_v36 = vmul.f32 %v2886_v1, %v2886_v1  ;;  %v3237_v30 = vmul.f32 %v3005_v14, %v2819_v17  ;;  %v557_v52 = vmul.f32 3.0, %v2886_v1 }
 0x18f   : > { %4178 = vst [vmem:[#allocation12_spill] sm:$0xff] %v3216_v12  ;;  %v1354_v42 = vand.u32 2139095040, %v3216_v12  ;;  %v4144_v56 = vand.u32 2147483647, %v3216_v12  ;;  %v3241_v43 = vmul.f32 28.0, %v1681_v20  ;;  %v1620_v28 = vsub.s32 4294967266, %v3226_v60 }
 0x190   : > { %v3223_v24 = vshrl.u32 %v1295_v37, 30  ;;  %4179 = vst [vmem:[#allocation13_spill] sm:$0xff] %v3233_v36  ;;  %v3248_v0 = vadd.f32 1.0, %v1174_v25  ;;  %v3251_v59 = vmul.f32 %v1182_v39, %v3142_v44  ;;  %v3254_v17 = vmul.f32 %v1685_v7, %v3152_v15 }
 0x191   : > { %v1355_v47 = vshrl.u32 %v1354_v42, 23  ;;  %576 = vrot.lane.b32.xlu2 %v2886_v1, %s2675_s21  ;;  %4180 = vst [vmem:[#allocation14_spill] sm:$0xff] %v3237_v30  ;;  %v3258_v63 = vand.u32 3, %v1185_v35  ;;  %v3260_v4 = vmul.f32 48.0, %v1685_v7  ;;  %v3266_v46 = vadd.s32 %v3034_v34, %v3029_v55 }
 0x192   : > { %v1297_v32 = vshll.u32 %v3223_v24, 30  ;;  %v1358_v44 = vand.u32 8388607, %v4144_v56  ;;  %v3271_v62 = vmul.f32 %v557_v52, %v2886_v1  ;;  %v3274_v20 = vadd.s32 127, %v1620_v28 }
 0x193   : > { %v2461_v11 = vadd.s32 4294967169, %v1355_v47  ;;  %v3283_v8 = vadd.s32 %v3183_v33, %v3178_v49  ;;  %v529_v42 = vmul.f32 1.7320508, %v2886_v1  ;;  %v555_v7 = vmul.f32 3.0, %v3237_v30 }
 0x194   : > { %v3244_v31 = vsub.s32 %v1294_v50, %v1297_v32  ;;  %600 = vrot.lane.b32.xlu1 %v3233_v36, %s2676_s22  ;;  %4181 = vst [vmem:[#allocation15_spill] sm:$0xff] %v3271_v62  ;;  %v2443_v25 = vadd.f32 -1.0, %v3190_v27  ;;  %v1359_v47 = vor.u32 8388608, %v1358_v44  ;;  %v659_v32 = vmul.f32 5.0, %v3237_v30 }
 0x195   : > { %v1361_v54 = vadd.s32 1, %v2461_v11  ;;  %572 = vrot.lane.b32.xlu0 %v3237_v30, %s2675_s21  ;;  %v4184_v37 = vmov 1326507024   ;;  %vm1188_vm5 = vcmp.eq.s32.totalorder %v3258_v63, 0  ;;  %vm1191_vm8 = vcmp.eq.s32.totalorder %v3258_v63, 2 }
 0x196   : > { %vm1299_vm12 = vcmp.lt.s32.totalorder %v3244_v31, 0  ;;  %v1300_v9 = vsub.s32 0, %v3244_v31  ;;  %vm1187_vm10 = vcmp.lt.s32.totalorder %v3258_v63, 2 }
 0x197   : > { %vm1362_vm13 = vcmp.gt.s32.totalorder %v1361_v54, 0 }
 0x198   : > { %v1301_v50 = vsel %vm1299_vm12, %v1300_v9, %v3244_v31  ;;  %v1363_v3 = vsel %vm1362_vm13, %v1361_v54, 0  ;;  %v4182_v9 = vmov 2102212464  }
 0x199   : > { %v1302_v55 = vclz %v1301_v50  ;;  %v1365_v34 = vand.u32 31, %v1363_v3  ;;  %752 = vrot.lane.b32.xlu2 %v3271_v62, %s2676_s22  ;;  %v3291_v11 = vshrl.u32 %v1363_v3, 5  ;;  %v4183_v3 = vmov 920167782  }
 0x19b   : > { %v2459_v39 = vadd.s32 4294967294, %v1302_v55  ;;  %v3288_v35 = vsub.s32 32, %v1365_v34  ;;  %v1368_v52 = vshll.u32 %v4145_v16, %v1365_v34  ;;  %v1371_v28 = vshll.u32 %v2678_v19, %v1365_v34 }
 0x19c   : > { %v1374_v49 = vshll.u32 %v2679_v21, %v1365_v34  ;;  %540 = vrot.lane.b32.xlu1 %v3237_v30, %s2676_s22  ;;  %v1377_v44 = vshll.u32 %v4182_v9, %v1365_v34  ;;  %v1380_v56 = vshll.u32 %v4183_v3, %v1365_v34  ;;  %vm1383_vm15 = vcmp.lt.s32.totalorder %v3291_v11, 1 }
 0x19d   : > { %vm2460_vm14 = vcmp.lt.s32.totalorder %v2459_v39, 0  ;;  %v1369_v33 = vshrl.u32 %v2678_v19, %v3288_v35  ;;  %v1372_v54 = vshrl.u32 %v2679_v21, %v3288_v35  ;;  %776 = vrot.lane.b32.xlu0 %v529_v42, %s2684_s27  ;;  %v1375_v50 = vshrl.u32 %v4182_v9, %v3288_v35 }
 0x19e   : > { %v1378_v55 = vshrl.u32 %v4183_v3, %v3288_v35  ;;  %v1381_v6 = vshrl.u32 %v4184_v37, %v3288_v35  ;;  %v3311_v5 = vsel %vm2460_vm14, 0, %v2459_v39  ;;  %v3316_v21 = vmul.f32 %v555_v7, %v3237_v30 }
 0x19f   : > { %v3313_v19 = vor.u32 %v1369_v33, %v1368_v52  ;;  %v2451_v42 = vadd.f32 -3.0, %v3196_v18  ;;  %v3319_v16 = vor.u32 %v1372_v54, %v1371_v28  ;;  %v3321_v9 = vor.u32 %v1375_v50, %v1374_v49 }
 0x1a0   : > { %v1379_v45 = vor.u32 %v1378_v55, %v1377_v44  ;;  %v1382_v36 = vor.u32 %v1381_v6, %v1380_v56  ;;  %v690_v37 = vmul.f32 1.3228756, %v2861_v51  ;;  %v663_v34 = vmul.f32 %v659_v32, %v3237_v30 }
 0x1a1   : > { %748 = vrot.lane.b32.xlu2 %v3316_v21, %s2676_s22  ;;  %v661_v7 = vmul.f32 5.0, %v2886_v1  ;;  %vm1386_vm2 = vcmp.lt.s32.totalorder %v3291_v11, 4  ;;  %v1391_v18 = vsel %vm1383_vm15, %v3313_v19, %v3319_v16  ;;  %v3334_v39 = vshll.u32 %v1359_v47, 8 }
 0x1a2   : > { %v566_v56 = vmul.f32 1.118034, %v2443_v25  ;;  %v1310_v6 = vsub.s32 4294967266, %v3311_v5  ;;  %vm1385_vm3 = vcmp.lt.s32.totalorder %v3291_v11, 3  ;;  %v1392_v52 = vsel %vm1386_vm2, %v1379_v45, 920167782 }
 0x1a3   : > { %v698_v32 = vmul.f32 %v2451_v42, %v690_v37  ;;  %vm1384_vm4 = vcmp.lt.s32.totalorder %v3291_v11, 2  ;;  %v1393_v28 = vsel %vm1385_vm3, %v3321_v9, %v1392_v52  ;;  %v1395_v47 = vsel %vm1383_vm15, %v3319_v16, %v3321_v9 }
 0x1a4   : > { %v1396_v25 = vsel %vm1386_vm2, %v1382_v36, 1326507024  ;;  %802 = vrot.lane.b32.xlu1 %v566_v56, %s2685_s28  ;;  %v1394_v49 = vsel %vm1384_vm4, %v1391_v18, %v1393_v28  ;;  %v3355_v33 = vmul.f32 %v661_v7, %v2886_v1  ;;  %v691_v54 = vmul.f32 1.3228756, %v3237_v30 }
 0x1a5   : > { %898 = vrot.lane.b32.xlu0 %v698_v32, %s2686_s29  ;;  %v2452_v44 = vadd.f32 -3.0, %v663_v34  ;;  %v1397_v50 = vsel %vm1385_vm3, %v1379_v45, %v1396_v25  ;;  %v1400_v36 = vand.u32 65535, %v3334_v39  ;;  %v1424_v3 = vand.u32 65535, %v1394_v49 }
 0x1a6   : > { %v1425_v55 = vshrl.u32 %v1394_v49, 16  ;;  %v1398_v42 = vsel %vm1384_vm4, %v1395_v47, %v1397_v50  ;;  %v1401_v37 = vshrl.u32 %v3334_v39, 16  ;;  %v3364_v18 = vadd.f32 -1.0, %v663_v34 }
 0x1a7   : > { %v2446_v7 = vadd.f32 -1.0, %v3271_v62  ;;  %v1311_v56 = vadd.s32 127, %v1310_v6  ;;  %v1402_v52 = vand.u32 65535, %v1398_v42  ;;  %v1403_v32 = vshrl.u32 %v1398_v42, 16 }
 0x1a8   : > { %v1427_v28 = vmul.u32 %v1425_v55, %v1400_v36  ;;  %v3369_v45 = vmul.f32 %v3202_v41, %v2827_v23  ;;  %v3371_v25 = vmul.u32 %v1424_v3, %v1401_v37  ;;  %v3376_v47 = vadd.f32 -1.0, %v3355_v33 }
 0x1a9   : > { %676 = vrot.lane.b32.xlu2 %v3364_v18, %s2676_s22  ;;  %v3380_v34 = vmul.f32 %v3237_v30, %v3237_v30  ;;  %v1405_v6 = vmul.u32 %v1403_v32, %v1400_v36  ;;  %v1406_v49 = vmul.u32 %v1402_v52, %v1401_v37  ;;  %v699_v50 = vmul.f32 %v2452_v44, %v691_v54 }
 0x1aa   : > { %v527_v42 = vmul.f32 1.7320508, %v3237_v30  ;;  %v1306_v23 = vsub.s32 32, %v3311_v5  ;;  %v1426_v62 = vmul.u32 %v1424_v3, %v1400_v36  ;;  %v1430_v27 = vshll.u32 %v1427_v28, 16 }
 0x1ab   : > { %4185 = vst [vmem:[#allocation16_spill] sm:$0xff] %v3380_v34  ;;  %v569_v58 = vmul.f32 1.118034, %v2446_v7  ;;  %v1312_v41 = vshll.u32 %v1311_v56, 23  ;;  %v1404_v14 = vmul.u32 %v1402_v52, %v1400_v36  ;;  %v1408_v57 = vshll.u32 %v1405_v6, 16 }
 0x1ac   : > { %v1429_v10 = vmul.u32 %v1425_v55, %v1401_v37  ;;  %680 = vrot.lane.b32.xlu1 %v3376_v47, %s2676_s22  ;;  %v1407_v12 = vmul.u32 %v1403_v32, %v1401_v37  ;;  %v1432_v54 = vshll.u32 %v3371_v25, 16  ;;  %vm1434_vm9 = vc.u32 %v1426_v62, %v1430_v27 }
 0x1ad   : > { %v1436_v44 = vadd.s32 %v1430_v27, %v1426_v62  ;;  %596 = vrot.lane.b32.xlu0 %v3380_v34, %s2676_s22  ;;  %v1410_v3 = vshll.u32 %v1406_v49, 16  ;;  %vm1412_vm11 = vc.u32 %v1404_v14, %v1408_v57  ;;  %v1414_v36 = vadd.s32 %v1408_v57, %v1404_v14 }
 0x1ae   : > { %v4186_v7 = vmov 0   ;;  %v1388_v56 = vsel %vm1386_vm2, %v3321_v9, 2102212464  ;;  %v4187_v27 = vmov 683565275   ;;  %v1308_v30 = vshrl.u32 %v3283_v8, %v1306_v23  ;;  %v3403_v9 = vpop.permute.xlu2 %2042 }
 0x1af   : > { %v1435_v55 = vsel %vm1434_vm9, 1, %v4186_v7  ;;  %v1413_v37 = vsel %vm1412_vm11, 1, %v4186_v7  ;;  %vm1438_vm12 = vc.u32 %v1436_v44, %v1432_v54  ;;  %v1367_v62 = vshrl.u32 %v4187_v27, %v3288_v35 }
 0x1b0   : > { %v1437_v52 = vadd.s32 %v1435_v55, %v1429_v10  ;;  %v1415_v32 = vadd.s32 %v1413_v37, %v1407_v12  ;;  %vm1416_vm13 = vc.u32 %v1414_v36, %v1410_v3  ;;  %v1439_v34 = vsel %vm1438_vm12, 1, %v4186_v7 }
 0x1b1   : > { %v1417_v14 = vsel %vm1416_vm13, 1, %v4186_v7  ;;  %v1431_v57 = vshrl.u32 %v1427_v28, 16  ;;  %900 = vrot.lane.b32.xlu2 %v699_v50, %s2686_s29  ;;  %v1387_v10 = vsel %vm1383_vm15, %v1367_v62, %v3313_v19  ;;  %v1389_v12 = vsel %vm1385_vm3, %v3319_v16, %v1388_v56 }
 0x1b2   : > { %v1441_v51 = vadd.s32 %v1439_v34, %v1437_v52  ;;  %v1409_v35 = vshrl.u32 %v1405_v6, 16  ;;  %v1419_v3 = vadd.s32 %v1417_v14, %v1415_v32  ;;  %v1307_v8 = vshll.u32 %v3244_v31, %v3311_v5 }
 0x1b3   : > { %v1313_v23 = vor.u32 4788187, %v1312_v41  ;;  %v1433_v28 = vshrl.u32 %v3371_v25, 16  ;;  %v4188_v50 = vxor.u32 2147483648, %v3251_v59  ;;  %v4189_v19 = vsub.s32 32, %v3226_v60 }
 0x1b4   : > { %v1442_v34 = vadd.s32 %v1441_v51, %v1431_v57  ;;  %v1411_v16 = vshrl.u32 %v1406_v49, 16  ;;  %v1420_v6 = vadd.s32 %v1419_v3, %v1409_v35  ;;  %808 = vrot.lane.b32.xlu1 %v569_v58, %s2685_s28  ;;  %v1622_v31 = vshll.u32 %v3274_v20, 23 }
 0x1b5   : > { %v1190_v36 = vsel %vm1188_vm5, %v3248_v0, %v4188_v50  ;;  %v1618_v7 = vshrl.u32 %v3266_v46, %v4189_v19  ;;  %v1309_v41 = vor.u32 %v1308_v30, %v1307_v8  ;;  %v1390_v51 = vsel %vm1384_vm4, %v1387_v10, %v1389_v12  ;;  %772 = vrot.lane.b32.xlu0 %v527_v42, %s2684_s27 }
 0x1b6   : > { %v1443_v5 = vadd.s32 %v1442_v34, %v1433_v28  ;;  %v4190_v25 = vxor.u32 2147483648, %v3248_v0  ;;  %v3432_v46 = vadd.s32 %v1420_v6, %v1411_v16  ;;  %v3434_v49 = vadd.s32 %v1436_v44, %v1432_v54  ;;  %v3453_v32 = vpop.permute.xlu2 %2044 }
 0x1b7   : > { %v2454_v58 = vadd.f32 -3.0, %v3355_v33  ;;  %v1314_v20 = vand.u32 2147483647, %v1313_v23  ;;  %v3441_v42 = vmul.f32 %v3369_v45, %v3369_v45  ;;  %v1444_v0 = vmul.u32 %v3334_v39, %v1390_v51 }
 0x1b8   : > { %v1193_v55 = vsel %vm1191_vm8, %v4190_v25, %v3251_v59  ;;  %v1447_v11 = vadd.s32 1, %v1443_v5  ;;  %vm1446_vm14 = vc.u32 %v3432_v46, %v3434_v49  ;;  %v693_v59 = vmul.f32 1.3228756, %v2886_v1 }
 0x1b9   : > { %v1194_v30 = vsel %vm1187_vm10, %v1190_v36, %v1193_v55  ;;  %v1697_v54 = vsub.f32 1.0, %v3241_v43  ;;  %v1617_v33 = vshll.u32 %v3145_v26, %v3226_v60  ;;  %v1623_v63 = vor.u32 4788187, %v1622_v31  ;;  %598 = vrot.lane.b32.xlu2 %v3441_v42, %s2676_s22  ;;  %v379_v55 = vld [vmem:[%s4131_s4] sm:$0xff] }
 0x1ba   : > { %v1316_v44 = vcvt.s32.f32 %v1309_v41  ;;  %v1448_v56 = vsel %vm1446_vm14, %v1447_v11, %v1443_v5  ;;  %vm1184_vm15 = vweird.f32 %v2865_v53  ;;  %v701_v39 = vmul.f32 %v2454_v58, %v693_v59  ;;  %v400_v53 = vld [vmem:[%s4134_s7] sm:$0xf]  ;;  %1803 = vmatpush.msrb.mxu2 %v379_v55 }
 0x1bb   : > { %v1449_v37 = vadd.s32 %v1448_v56, %v1444_v0  ;;  %v1195_v52 = vsel %vm1184_vm15, nan, %v1194_v30  ;;  %v1619_v27 = vor.u32 %v1618_v7, %v1617_v33  ;;  %v1709_v43 = vmul.f32 21.0, %v3254_v17  ;;  %2486 = vmatpush.msk.msrb.mxu1 %vm1747_vm6, %v400_v53 }
 0x1bc   : > { %v1317_v62 = vmul.f32 %v1316_v44, %v1314_v20  ;;  %904 = vrot.lane.b32.xlu1 %v701_v39, %s2686_s29  ;;  %v1705_v26 = vadd.f32 %v3260_v4, %v1697_v54  ;;  %v1624_v60 = vand.u32 2147483647, %v1623_v63  ;;  %v1661_v57 = vmul.f32 0.6324555, %v1195_v52  ;;  %2487 = vmatmul.msk.f32.vlgmr.msrb.gmra.mxu1 %vm972_vm7, %v3041_v40  ;;  %v4204_v44 = vld [vmem:[#allocation7_spill] sm:$0xff] }
 0x1bd   : > { %v1450_v14 = vadd.s32 536870912, %v1449_v37  ;;  %708 = vrot.lane.b32.xlu0 %v3376_v47, %s2675_s21  ;;  %v2444_v12 = vadd.f32 -1.0, %v3316_v21  ;;  %v1626_v17 = vcvt.s32.f32 %v1619_v27  ;;  %v3468_v3 = vmul.f32 0.2, %v3012_v22 }
 0x1be   : > { %v1318_v35 = vxor.u32 2147483648, %v1317_v62  ;;  %v528_v4 = vmul.f32 1.7320508, %v3369_v45  ;;  %v1713_v8 = vsub.f32 %v1705_v26, %v1709_v43  ;;  %vm1717_vm2 = vcmp.lt.f32.partialorder %v3152_v15, 1.0  ;;  %v3506_v5 = vpop.permute.xlu2 %2048 }
 0x1bf   : > { %v3463_v10 = vshrl.u32 %v1450_v14, 30  ;;  %v1627_v23 = vmul.f32 %v1626_v17, %v1624_v60  ;;  %v660_v28 = vmul.f32 5.0, %v3369_v45  ;;  %v1665_v34 = vmul.f32 %v1661_v57, %v2855_v48  ;;  %v3550_v57 = vpop.permute.xlu1 %538 }
 0x1c0   : > { %vm1198_vm6 = vcmp.lt.s32.totalorder %v3019_v38, 0  ;;  %v567_v50 = vmul.f32 1.118034, %v2444_v12  ;;  %v3482_v36 = vmul.f32 0.2, %v2880_v61  ;;  %v1674_v15 = vmul.f32 %v3468_v3, %v3468_v3 }
 0x1c1   : > { %v1452_v47 = vshll.u32 %v3463_v10, 30  ;;  %774 = vrot.lane.b32.xlu2 %v528_v4, %s2684_s27  ;;  %v1319_v40 = vsel %vm1198_vm6, %v1318_v35, %v1317_v62  ;;  %v2687_v19 = vmov 0.0   ;;  %v3492_v16 = vmul.f32 0.2, %v3207_v29  ;;  %v4197_v62 = vld [vmem:[#allocation5_spill] sm:$0xff] }
 0x1c2   : > { %v2467_v7 = vsel %vm1717_vm2, 1.0, %v2687_v19  ;;  %v1628_v6 = vxor.u32 2147483648, %v1627_v23  ;;  %v4191_v31 = vand.u32 2147483647, %v3019_v38  ;;  %v3504_v51 = vmul.f32 %v660_v28, %v3369_v45 }
 0x1c3   : > { %v3479_v22 = vsub.s32 %v1449_v37, %v1452_v47  ;;  %v1729_v61 = vmul.f32 %v2467_v7, %v1713_v8  ;;  %vm992_vm5 = vcmask 64512   ;;  %v1678_v30 = vmul.f32 %v1674_v15, %v1674_v15 }
 0x1c4   : > { %804 = vrot.lane.b32.xlu1 %v567_v50, %s2685_s28  ;;  %vm3497_vm4 = vcmp.le.f32.partialorder %v4191_v31, 0.7853982  ;;  %2488 = vmatmul.msk.f32.gmra.mxu1 %vm972_vm7, %v3064_v13  ;;  %vm1508_vm8 = vcmp.lt.s32.totalorder %v2890_v2, 0  ;;  %v1675_v11 = vmul.f32 %v3492_v16, %v3492_v16  ;;  %v2449_v33 = vadd.f32 -1.0, %v3504_v51 }
 0x1c5   : > { %vm1454_vm3 = vcmp.lt.s32.totalorder %v3479_v22, 0  ;;  %v1455_v48 = vsub.s32 0, %v3479_v22  ;;  %704 = vrot.lane.b32.xlu0 %v3364_v18, %s2675_s21  ;;  %v3511_v29 = vsel %vm3497_vm4, %v3019_v38, %v1319_v40  ;;  %v1733_v58 = vmul.f32 %v1729_v61, %v1665_v34 }
 0x1c6   : > { %v1676_v18 = vmul.f32 %v3482_v36, %v3482_v36  ;;  %v1629_v0 = vsel %vm1508_vm8, %v1628_v6, %v1627_v23  ;;  %v1324_v59 = vmul.f32 %v3511_v29, %v3511_v29  ;;  %v1320_v63 = vsub.s32 4, %v3223_v24  ;;  %v3559_v8 = vpop.permute.xlu2 %594  ;;  %v4199_v6 = vld [vmem:[#allocation8_spill] sm:$0xff] }
 0x1c7   : > { %v1456_v25 = vsel %vm1454_vm3, %v1455_v48, %v3479_v22  ;;  %2474 = vmatmul.msk.f32.vlgmr.msrb.gmra.mxu2 %vm992_vm5, %v1733_v58  ;;  %v4194_v13 = vand.u32 2147483647, %v2890_v2  ;;  %v1682_v37 = vmul.f32 %v1678_v30, %v1674_v15  ;;  %v1679_v27 = vmul.f32 %v1675_v11, %v1675_v11  ;;  %v4198_v48 = vld [vmem:[#allocation12_spill] sm:$0xff] }
 0x1c8   : > { %v1457_v20 = vclz %v1456_v25  ;;  %v1680_v56 = vmul.f32 %v1676_v18, %v1676_v18  ;;  %v3544_v43 = vmul.f32 3.8729835, %v4197_v62  ;;  %v1445_v14 = vadd.s32 %v3434_v49, %v3432_v46 }
 0x1c9   : > { %vm3533_vm9 = vcmp.le.f32.partialorder %v4194_v13, 0.7853982  ;;  %v1325_v53 = vmul.f32 -0.001358992, %v1324_v59  ;;  %v556_v12 = vmul.f32 3.0, %v3369_v45  ;;  %v1321_v17 = vsel %vm1198_vm6, %v1320_v63, %v3223_v24 }
 0x1ca   : > { %v2462_v54 = vadd.s32 4294967294, %v1457_v20  ;;  %v3540_v39 = vsel %vm3533_vm9, %v2890_v2, %v1629_v0  ;;  %v1332_v35 = vmul.f32 -0.00019511016, %v1324_v59  ;;  %v550_v4 = vmul.f32 %v3550_v57, %v3544_v43 }
 0x1cb   : > { %v1326_v23 = vadd.f32 0.041655596, %v1325_v53  ;;  %v3561_v28 = vmul.f32 %v1680_v56, %v1676_v18  ;;  %v1686_v34 = vmul.f32 %v1682_v37, %v3468_v3  ;;  %v1694_v40 = vmul.f32 28.0, %v1682_v37 }
 0x1cc   : > { %vm2463_vm10 = vcmp.lt.s32.totalorder %v2462_v54, 0  ;;  %678 = vrot.lane.b32.xlu1 %v2449_v33, %s2676_s22  ;;  %v1333_v50 = vadd.f32 0.008332121, %v1332_v35  ;;  %786 = vrot.lane.b32.xlu2 %v550_v4, %s2685_s28  ;;  %v3567_v24 = vmul.f32 %v3540_v39, %v3540_v39  ;;  %vm1353_vm11 = vcmp.lt.s32.totalorder %v4198_v48, 0 }
 0x1cd   : > { %v1460_v52 = vsel %vm2463_vm10, 0, %v2462_v54  ;;  %542 = vrot.lane.b32.xlu0 %v3369_v45, %s2676_s22  ;;  %v1683_v61 = vmul.f32 %v1679_v27, %v1675_v11  ;;  %v606_v31 = vsub.f32 %v4199_v6, %v3559_v8  ;;  %v1323_v25 = vsel %vm3497_vm4, 0, %v1321_v17 }
 0x1ce   : > { %v1461_v26 = vsub.s32 32, %v1460_v52  ;;  %v1465_v60 = vsub.s32 4294967266, %v1460_v52  ;;  %v1462_v46 = vshll.u32 %v3479_v22, %v1460_v52  ;;  %v1327_v22 = vmul.f32 %v1326_v23, %v1324_v59 }
 0x1cf   : > { %v1334_v55 = vmul.f32 %v1333_v50, %v1324_v59  ;;  %v4200_v58 = vand.u32 2147483647, %v4198_v48  ;;  %v3581_v20 = vmul.f32 %v556_v12, %v3369_v45  ;;  %v1690_v54 = vmul.f32 %v1686_v34, %v3468_v3 }
 0x1d0   : > { %v1463_v49 = vshrl.u32 %v1445_v14, %v1461_v26  ;;  %v1466_v47 = vadd.s32 127, %v1465_v60  ;;  %v1328_v0 = vadd.f32 -0.4999988, %v1327_v22  ;;  %v1698_v63 = vsub.f32 1.0, %v1694_v40  ;;  %v386_v22 = vld [vmem:[%s4133_s6 + $0x10] sm:$0xff] }
 0x1d1   : > { %vm3576_vm12 = vcmp.le.f32.partialorder %v4200_v58, 0.7853982  ;;  %v1335_v11 = vadd.f32 -0.16666654, %v1334_v55  ;;  %v1702_v41 = vmul.f32 48.0, %v1686_v34  ;;  %v1340_v52 = vadd.s32 3, %v1323_v25 }
 0x1d2   : > { %v1464_v15 = vor.u32 %v1463_v49, %v1462_v46  ;;  %v1467_v7 = vshll.u32 %v1466_v47, 23  ;;  %v1329_v37 = vmul.f32 %v1328_v0, %v1324_v59  ;;  %v3588_v27 = vmul.f32 %v1683_v61, %v3492_v16  ;;  %v387_v49 = vld [vmem:[%s4133_s6 + $0x18] sm:$0xff]  ;;  %v4203_v34 = vld [vmem:[#allocation9_spill] sm:$0xff] }
 0x1d3   : > { %v610_v14 = vmul.f32 1.9364917, %v606_v31  ;;  %v3591_v26 = vmul.f32 3.8729835, %v2886_v1  ;;  %v2445_v53 = vadd.f32 -1.0, %v3581_v20  ;;  %v1706_v4 = vadd.f32 %v1702_v41, %v1698_v63  ;;  %2031 = vmatpush.msra.mxu1 %v387_v49 }
 0x1d4   : > { %v1468_v30 = vor.u32 4788187, %v1467_v7  ;;  %706 = vrot.lane.b32.xlu1 %v2449_v33, %s2675_s21  ;;  %v1471_v56 = vcvt.s32.f32 %v1464_v15  ;;  %v1336_v33 = vmul.f32 %v1335_v11, %v1324_v59  ;;  %v3595_v12 = vmul.f32 1.3228756, %v3369_v45 }
 0x1d5   : > { %574 = vrot.lane.b32.xlu0 %v3369_v45, %s2675_s21  ;;  %v1330_v17 = vadd.f32 1.0, %v1329_v37  ;;  %v1710_v46 = vmul.f32 21.0, %v1690_v54  ;;  %vm1718_vm13 = vcmp.lt.f32.partialorder %v3468_v3, 1.0  ;;  %834 = vrot.lane.b32.xlu2 %v610_v14, %s2688_s17  ;;  %v3603_v47 = vadd.f32 -3.0, %v3504_v51  ;;  %s2689_s21 = smov 2   ;;  %v3631_v54 = vpop.permute.xlu1 %544 }
 0x1d6   : > { %v1469_v13 = vand.u32 2147483647, %v1468_v30  ;;  %v1337_v35 = vadd.f32 1.0, %v1336_v33  ;;  %v1341_v23 = vand.u32 3, %v1340_v52  ;;  %v1630_v50 = vsub.s32 4, %v4203_v34  ;;  %2032 = vmatpush.msra.mxu1 %v386_v22 }
 0x1d7   : > { %vm1339_vm14 = vweird.f32 %v3019_v38  ;;  %v1347_v15 = vxor.u32 2147483648, %v1330_v17  ;;  %v1475_v7 = vsub.s32 4, %v3463_v10  ;;  %v568_v51 = vmul.f32 1.118034, %v2445_v53 }
 0x1d8   : > { %v1472_v60 = vmul.f32 %v1471_v56, %v1469_v13  ;;  %v1338_v40 = vmul.f32 %v1337_v35, %v3511_v29  ;;  %v2468_v55 = vsel %vm1718_vm13, 1.0, %v2687_v19  ;;  %v3619_v29 = vmul.f32 %v3588_v27, %v3492_v16  ;;  %v385_v13 = vld [vmem:[%s4133_s6 + $0x8] sm:$0xff]  ;;  %v384_v56 = vld [vmem:[%s4133_s6] sm:$0xff] }
 0x1d9   : > { %v1714_v0 = vsub.f32 %v1706_v4, %v1710_v46  ;;  %v1695_v11 = vmul.f32 28.0, %v1683_v61  ;;  %vm1343_vm15 = vcmp.eq.s32.totalorder %v1341_v23, 0  ;;  %vm1346_vm2 = vcmp.eq.s32.totalorder %v1341_v23, 2  ;;  %2033 = vmatpush.msra.mxu1 %v385_v13 }
 0x1da   : > { %v1473_v59 = vxor.u32 2147483648, %v1472_v60  ;;  %v1344_v30 = vxor.u32 2147483648, %v1338_v40  ;;  %v1631_v63 = vsel %vm1508_vm8, %v1630_v50, %v4203_v34  ;;  %vm1342_vm6 = vcmp.lt.s32.totalorder %v1341_v23, 2 }
 0x1db   : > { %v1476_v61 = vsel %vm1353_vm11, %v1475_v7, %v3463_v10  ;;  %v1635_v33 = vmul.f32 -0.001358992, %v3567_v24  ;;  %v553_v10 = vmul.f32 %v3631_v54, %v3591_v26  ;;  %v1633_v53 = vsel %vm3533_vm9, 0, %v1631_v63  ;;  %2034 = vmatpush.msra.mxu1 %v384_v56 }
 0x1dc   : > { %v1474_v25 = vsel %vm1353_vm11, %v1473_v59, %v1472_v60  ;;  %726 = vrot.lane.b32.xlu1 %v606_v31, %s2689_s21  ;;  %v1345_v41 = vsel %vm1343_vm15, %v1330_v17, %v1344_v30  ;;  %v1348_v31 = vsel %vm1346_vm2, %v1347_v15, %v1338_v40  ;;  %v1642_v17 = vmul.f32 -0.00019511016, %v3567_v24  ;;  %v3659_v40 = vpop.permute.xlu0 %2046 }
 0x1dd   : > { %v3624_v58 = vsel %vm3576_vm12, %v4198_v48, %v1474_v25  ;;  %750 = vrot.lane.b32.xlu0 %v3581_v20, %s2676_s22  ;;  %v1349_v37 = vsel %vm1342_vm6, %v1345_v41, %v1348_v31  ;;  %v1730_v4 = vmul.f32 %v2468_v55, %v1714_v0  ;;  %v1478_v59 = vsel %vm3576_vm12, 0, %v1476_v61  ;;  %s2692_s22 = smov 15  }
 0x1de   : > { %v1479_v3 = vmul.f32 %v3624_v58, %v3624_v58  ;;  %v1350_v60 = vsel %vm1339_vm14, nan, %v1349_v37  ;;  %v1636_v38 = vadd.f32 0.041655596, %v1635_v33  ;;  %v1643_v34 = vadd.f32 0.008332121, %v1642_v17 }
 0x1df   : > { %v1662_v35 = vmul.f32 0.6324555, %v1350_v60  ;;  %vm1897_vm3 = vcmask 261120   ;;  %v1699_v55 = vsub.f32 1.0, %v1695_v11  ;;  %v1703_v30 = vmul.f32 48.0, %v3588_v27 }
 0x1e0   : > { %v1480_v52 = vmul.f32 -0.001358992, %v1479_v3  ;;  %v1487_v14 = vmul.f32 -0.00019511016, %v1479_v3  ;;  %v1637_v18 = vmul.f32 %v1636_v38, %v3567_v24  ;;  %v1644_v0 = vmul.f32 %v1643_v34, %v3567_v24 }
 0x1e1   : > { %v1666_v15 = vmul.f32 %v1662_v35, %v4204_v44  ;;  %v1650_v61 = vadd.s32 3, %v1633_v53  ;;  %v1495_v13 = vadd.s32 3, %v1478_v59  ;;  %v1688_v27 = vmul.f32 %v3561_v28, %v3482_v36 }
 0x1e2   : > { %v1481_v46 = vadd.f32 0.041655596, %v1480_v52  ;;  %v1488_v49 = vadd.f32 0.008332121, %v1487_v14  ;;  %v1638_v56 = vadd.f32 -0.4999988, %v1637_v18  ;;  %v700_v11 = vmul.f32 %v3603_v47, %v3595_v12 }
 0x1e3   : > { %v3655_v23 = vpop.f32.mrf.mxu1  ;;  %v3657_v50 = vpop.permute.xlu2 %746  ;;  %v1734_v63 = vmul.f32 %v1730_v4, %v1666_v15  ;;  %v1645_v37 = vadd.f32 -0.16666654, %v1644_v0  ;;  %v1711_v33 = vmul.f32 21.0, %v3619_v29  ;;  %v1651_v35 = vand.u32 3, %v1650_v61 }
 0x1e4   : > { %v1482_v7 = vmul.f32 %v1481_v46, %v1479_v3  ;;  %v1489_v22 = vmul.f32 %v1488_v49, %v1479_v3  ;;  %v1774_v25 = vmul.f32 0.5, %v3655_v23  ;;  %792 = vrot.lane.b32.xlu1 %v553_v10, %s2685_s28  ;;  %v1639_v60 = vmul.f32 %v1638_v56, %v3567_v24  ;;  %v571_v15 = vpop.permute.xlu0 %570 }
 0x1e5   : > { %806 = vrot.lane.b32.xlu0 %v568_v51, %s2685_s28  ;;  %2475 = vmatmul.msk.f32.gmra.mxu2 %vm992_vm5, %v1734_v63  ;;  %v1707_v51 = vadd.f32 %v1703_v30, %v1699_v55  ;;  %v1646_v10 = vmul.f32 %v1645_v37, %v3567_v24  ;;  %v1696_v4 = vmul.f32 28.0, %v3561_v28  ;;  %v1496_v49 = vand.u32 3, %v1495_v13 }
 0x1e6   : > { %v1483_v41 = vadd.f32 -0.4999988, %v1482_v7  ;;  %v1490_v31 = vadd.f32 -0.16666654, %v1489_v22  ;;  %2489 = vmatmul.msk.f32.vlgmr.msra.gmra.mxu1 %vm1897_vm3, %v1774_v25  ;;  %v1640_v12 = vadd.f32 1.0, %v1639_v60  ;;  %vm1494_vm4 = vweird.f32 %v4198_v48 }
 0x1e7   : > { %v1647_v47 = vadd.f32 1.0, %v1646_v10  ;;  %vm1719_vm8 = vcmp.lt.f32.partialorder %v3492_v16, 1.0  ;;  %v1692_v44 = vmul.f32 %v1688_v27, %v3482_v36  ;;  %v1715_v22 = vsub.f32 %v1707_v51, %v1711_v33  ;;  %v4207_v10 = vld [vmem:[#allocation10_spill] sm:$0xff] }
 0x1e8   : > { %v1484_v52 = vmul.f32 %v1483_v41, %v1479_v3  ;;  %v1491_v14 = vmul.f32 %v1490_v31, %v1479_v3  ;;  %v1657_v34 = vxor.u32 2147483648, %v1640_v12  ;;  %v1700_v25 = vsub.f32 1.0, %v1696_v4  ;;  %v4208_v4 = vld [vmem:[#allocation14_spill] sm:$0xff] }
 0x1e9   : > { %v1648_v28 = vmul.f32 %v1647_v47, %v3540_v39  ;;  %vm1498_vm9 = vcmp.eq.s32.totalorder %v1496_v49, 0  ;;  %vm1501_vm10 = vcmp.eq.s32.totalorder %v1496_v49, 2  ;;  %vm1653_vm11 = vcmp.eq.s32.totalorder %v1651_v35, 0 }
 0x1ea   : > { %v1485_v53 = vadd.f32 1.0, %v1484_v52  ;;  %v1492_v17 = vadd.f32 1.0, %v1491_v14  ;;  %v3678_v46 = vpop.f32.mrf.mxu3  ;;  %vm1497_vm12 = vcmp.lt.s32.totalorder %v1496_v49, 2  ;;  %vm1656_vm13 = vcmp.eq.s32.totalorder %v1651_v35, 2 }
 0x1eb   : > { %v1775_v59 = vmul.f32 0.5, %v3678_v46  ;;  %v3681_v3 = vpop.permute.xlu2 %576  ;;  %v1654_v55 = vxor.u32 2147483648, %v1648_v28  ;;  %vm1652_vm14 = vcmp.lt.s32.totalorder %v1651_v35, 2  ;;  %v1658_v0 = vsel %vm1656_vm13, %v1657_v34, %v1648_v28 }
 0x1ec   : > { %v1493_v29 = vmul.f32 %v1492_v17, %v3624_v58  ;;  %v1502_v38 = vxor.u32 2147483648, %v1485_v53  ;;  %v585_v24 = vmul.f32 %v3681_v3, %v3591_v26  ;;  %v1704_v58 = vmul.f32 48.0, %v1688_v27  ;;  %v4205_v27 = vld [vmem:[#allocation11_spill] sm:$0xff] }
 0x1ed   : > { %902 = vrot.lane.b32.xlu0 %v700_v11, %s2686_s29  ;;  %v1655_v18 = vsel %vm1653_vm11, %v1640_v12, %v1654_v55  ;;  %vm1649_vm15 = vweird.f32 %v2890_v2  ;;  %v582_v61 = vmul.f32 %v571_v15, %v3544_v43  ;;  %v2469_v56 = vsel %vm1719_vm8, 1.0, %v2687_v19  ;;  %v4206_v43 = vld [vmem:[#allocation6_spill] sm:$0xff]  ;;  %v4209_v12 = vld [vmem:[#allocation16_spill] sm:$0xff]  ;;  %v4211_v55 = vld [vmem:[#allocation15_spill] sm:$0xff] }
 0x1ee   : > { %v1499_v7 = vxor.u32 2147483648, %v1493_v29  ;;  %2490 = vmatmul.msk.f32.gmra.mxu1 %vm1897_vm3, %v1775_v59  ;;  %824 = vrot.lane.b32.xlu2 %v585_v24, %s2690_s16  ;;  %v1503_v26 = vsel %vm1501_vm10, %v1502_v38, %v1493_v29  ;;  %v1659_v41 = vsel %vm1652_vm14, %v1655_v18, %v1658_v0  ;;  %v1731_v52 = vmul.f32 %v2469_v56, %v1715_v22 }
 0x1ef   : > { %v1660_v37 = vsel %vm1649_vm15, nan, %v1659_v41  ;;  %v1708_v14 = vadd.f32 %v1704_v58, %v1700_v25  ;;  %v1712_v51 = vmul.f32 21.0, %v1692_v44  ;;  %vm1720_vm2 = vcmp.lt.f32.partialorder %v3482_v36, 1.0  ;;  %v4210_v25 = vld [vmem:[#allocation13_spill] sm:$0xff] }
 0x1f0   : > { %v1500_v39 = vsel %vm1498_vm9, %v1485_v53, %v1499_v7  ;;  %v1664_v33 = vmul.f32 0.6324555, %v1660_v37  ;;  %v618_v53 = vsub.f32 %v4207_v10, %v3559_v8  ;;  %v2470_v35 = vsel %vm1720_vm2, 1.0, %v2687_v19 }
 0x1f1   : > { %v1504_v30 = vsel %vm1497_vm12, %v1500_v39, %v1503_v26  ;;  %v1716_v2 = vsub.f32 %v1708_v14, %v1712_v51  ;;  %v3713_v49 = vmul.f32 2.09165, %v4208_v4  ;;  %v642_v29 = vmul.f32 10.246951, %v4197_v62 }
 0x1f2   : > { %v1505_v63 = vsel %vm1494_vm4, nan, %v1504_v30  ;;  %v1668_v16 = vmul.f32 %v1664_v33, %v4206_v43  ;;  %v654_v8 = vmul.f32 1.6201851, %v4197_v62  ;;  %vm958_vm6 = vcmask 7168  }
 0x1f3   : > { %v1663_v31 = vmul.f32 0.6324555, %v1505_v63  ;;  %v3697_v13 = vpop.permute.xlu2 %752  ;;  %v1732_v59 = vmul.f32 %v2470_v35, %v1716_v2  ;;  %v646_v28 = vmul.f32 %v642_v29, %v3550_v57  ;;  %v645_v57 = vmul.f32 10.246951, %v2886_v1 }
 0x1f4   : > { %v643_v51 = vmul.f32 10.246951, %v4208_v4  ;;  %vm963_vm4 = vcmask 15360   ;;  %vm977_vm8 = vcmask 39936   ;;  %v761_v29 = vsub.f32 %v4210_v25, %v3697_v13 }
 0x1f5   : > { %v1667_v11 = vmul.f32 %v1663_v31, %v4205_v27  ;;  %818 = vrot.lane.b32.xlu0 %v582_v61, %s2690_s16  ;;  %v1736_v38 = vmul.f32 %v1732_v59, %v1668_v16  ;;  %v650_v44 = vmul.f32 %v646_v28, %v571_v15  ;;  %v649_v30 = vmul.f32 %v645_v57, %v3631_v54 }
 0x1f6   : > { %v531_v15 = vmul.f32 3.8729835, %v4208_v4  ;;  %v655_v13 = vmul.f32 1.6201851, %v4208_v4  ;;  %vm982_vm9 = vcmask 48128   ;;  %vm987_vm10 = vcmask 56320  }
 0x1f7   : > { %v1735_v48 = vmul.f32 %v1731_v52, %v1667_v11  ;;  %v3704_v60 = vpop.permute.xlu0 %770  ;;  %v653_v41 = vmul.f32 %v649_v30, %v3681_v3 }
 0x1f8   : > { %v959_v2 = vsel %vm958_vm6, 1.0, %v3704_v60 }
 0x1f9   : > { %2476 = vmatmul.msk.f32.gmra.mxu2 %vm992_vm5, %v1735_v48 }
 0x1fb   : > { %v749_v17 = vpop.permute.xlu2 %748 }
 0x1fc   : > { %v759_v47 = vsub.f32 %v4209_v12, %v749_v17 }
 0x1fd   : > { %626 = vrot.lane.b32.xlu0 %v618_v53, %s2684_s27 }
 0x1fe   : > { %v3719_v36 = vmul.f32 %v759_v47, %v3713_v49  ;;  %v675_v24 = vpop.permute.xlu1 %674 }
 0x1ff   : > { %v703_v19 = vpop.permute.xlu0 %702  ;;  %v686_v18 = vmul.f32 %v675_v24, %v654_v8 }
 0x200   : > { %v714_v34 = vmul.f32 %v703_v19, %v654_v8  ;;  %v3774_v8 = vmul.f32 2.09165, %v2886_v1 }
 0x201   : > { %2477 = vmatmul.msk.f32.gmra.mxu2 %vm992_vm5, %v1736_v38  ;;  %v657_v38 = vmul.f32 1.6201851, %v2886_v1 }
 0x202   : > { %914 = vrot.lane.b32.xlu1 %v714_v34, %s2691_s25  ;;  %v765_v34 = vmul.f32 %v761_v29, %v3774_v8 }
 0x203   : > { %v3725_v7 = vpop.permute.xlu2 %676 }
 0x205   : > { %866 = vrot.lane.b32.xlu0 %v650_v44, %s2686_s29 }
 0x206   : > { %v601_v22 = vpop.permute.xlu1 %600 }
 0x207   : > { %v609_v58 = vsub.f32 %v4210_v25, %v601_v22  ;;  %v621_v39 = vsub.f32 %v4211_v55, %v601_v22  ;;  %v573_v26 = vpop.permute.xlu0 %572  ;;  %v687_v25 = vmul.f32 %v3725_v7, %v655_v13 }
 0x208   : > { %v583_v54 = vmul.f32 %v573_v26, %v531_v15 }
 0x209   : > { %632 = vrot.lane.b32.xlu2 %v621_v39, %s2684_s27  ;;  %v613_v53 = vmul.f32 1.9364917, %v609_v58 }
 0x20a   : > { %732 = vrot.lane.b32.xlu1 %v609_v58, %s2689_s21 }
 0x20b   : > { %v3736_v0 = vpop.permute.xlu2 %900 }
 0x20d   : > { %882 = vrot.lane.b32.xlu0 %v686_v18, %s2686_s29 }
 0x20e   : > { %v541_v63 = vpop.permute.xlu1 %540 }
 0x20f   : > { %v3739_v31 = vpop.permute.xlu0 %776  ;;  %v551_v61 = vmul.f32 %v541_v63, %v531_v15  ;;  %v647_v43 = vmul.f32 %v643_v51, %v541_v63 }
 0x210   : > { %v962_v51 = vsel %vm958_vm6, 1.0, %v3739_v31 }
 0x211   : > { %872 = vrot.lane.b32.xlu2 %v653_v41, %s2686_s29  ;;  %v651_v17 = vmul.f32 %v647_v43, %v573_v26  ;;  %v532_v26 = vmul.f32 3.8729835, %v3369_v45 }
 0x212   : > { %788 = vrot.lane.b32.xlu1 %v551_v61, %s2685_s28 }
 0x213   : > { %v599_v27 = vpop.permute.xlu2 %598 }
 0x214   : > { %v608_v55 = vsub.f32 %v3441_v42, %v599_v27  ;;  %v620_v41 = vsub.f32 %v3581_v20, %v599_v27  ;;  %v967_v20 = vsel %vm963_vm4, %v962_v51, %v3739_v31 }
 0x216   : > { %v803_v56 = vpop.permute.xlu1 %802  ;;  %v612_v30 = vmul.f32 1.9364917, %v608_v55 }
 0x217   : > { %v3743_v37 = vpop.permute.xlu0 %898 }
 0x21a   : > { %820 = vrot.lane.b32.xlu1 %v583_v54, %s2690_s16  ;;  %v656_v54 = vmul.f32 1.6201851, %v3369_v45 }
 0x21b   : > { %v3749_v48 = vpop.permute.xlu2 %774 }
 0x21e   : > { %v681_v11 = vpop.permute.xlu1 %680 }
 0x21f   : > { %v597_v52 = vpop.permute.xlu0 %596  ;;  %v689_v28 = vmul.f32 %v681_v11, %v657_v38 }
 0x220   : > { %v607_v14 = vsub.f32 %v4209_v12, %v597_v52  ;;  %v619_v3 = vsub.f32 %v3316_v21, %v597_v52  ;;  %v964_v21 = vsel %vm963_vm4, %v959_v2, %v3704_v60 }
 0x221   : > { %v968_v35 = vsel %vm461_vm1, %v964_v21, %v3704_v60  ;;  %v3811_v21 = vmul.f32 2.09165, %v3369_v45 }
 0x222   : > { %v611_v33 = vmul.f32 1.9364917, %v607_v14  ;;  %728 = vrot.lane.b32.xlu1 %v607_v14, %s2689_s21  ;;  %628 = vrot.lane.b32.xlu2 %v619_v3, %s2684_s27 }
 0x224   : > { %836 = vrot.lane.b32.xlu0 %v611_v33, %s2688_s17 }
 0x226   : > { %v3756_v16 = vpop.permute.xlu1 %808  ;;  %v787_v12 = vpop.permute.xlu2 %786 }
 0x227   : > { %v3760_v10 = vpop.permute.xlu0 %772  ;;  %v973_v47 = vsel %vm972_vm7, %v968_v35, %v787_v12 }
 0x228   : > { %v978_v59 = vsel %vm977_vm8, %v973_v47, %v787_v12 }
 0x229   : > { %v983_v63 = vsel %vm982_vm9, %v978_v59, %v803_v56  ;;  %v644_v56 = vmul.f32 10.246951, %v3369_v45 }
 0x22a   : > { %868 = vrot.lane.b32.xlu1 %v651_v17, %s2686_s29  ;;  %840 = vrot.lane.b32.xlu2 %v613_v53, %s2688_s17  ;;  %v971_v17 = vsel %vm461_vm1, %v967_v20, %v3739_v31 }
 0x22e   : > { %v3771_v24 = vpop.permute.xlu1 %904 }
 0x22f   : > { %v709_v60 = vpop.permute.xlu0 %708  ;;  %v3797_v14 = vpop.permute.xlu2 %834 }
 0x230   : > { %v717_v19 = vmul.f32 %v709_v60, %v657_v38 }
 0x232   : > { %920 = vrot.lane.b32.xlu0 %v717_v19, %s2691_s25  ;;  %888 = vrot.lane.b32.xlu2 %v689_v28, %s2686_s29 }
 0x233   : > { %952 = vrot.lane.b32.xlu1 %v765_v34, %s2692_s22 }
 0x236   : > { %v3781_v44 = vpop.permute.xlu1 %804 }
 0x237   : > { %v705_v22 = vpop.permute.xlu0 %704 }
 0x238   : > { %v715_v58 = vmul.f32 %v705_v22, %v655_v13 }
 0x239   : > { %v3830_v22 = vpop.f32.mrf.mxu1 }
 0x23a   : > { %916 = vrot.lane.b32.xlu2 %v715_v58, %s2691_s25  ;;  %884 = vrot.lane.b32.xlu0 %v687_v25, %s2686_s29 }
 0x23e   : > { %v679_v39 = vpop.permute.xlu1 %678 }
 0x23f   : > { %v543_v57 = vpop.permute.xlu0 %542  ;;  %v688_v3 = vmul.f32 %v679_v39, %v656_v54 }
 0x240   : > { %v552_v18 = vmul.f32 %v543_v57, %v532_v26  ;;  %v648_v43 = vmul.f32 %v644_v56, %v543_v57  ;;  %v721_v56 = vmul.f32 5.1234756, %v2886_v1 }
 0x242   : > { %790 = vrot.lane.b32.xlu2 %v552_v18, %s2685_s28  ;;  %838 = vrot.lane.b32.xlu0 %v612_v30, %s2688_s17  ;;  %v3842_v30 = vpop.f32.mrf.mxu1 }
 0x246   : > { %v707_v15 = vpop.permute.xlu1 %706 }
 0x247   : > { %v575_v7 = vpop.permute.xlu0 %574  ;;  %v716_v28 = vmul.f32 %v707_v15, %v656_v54 }
 0x248   : > { %v584_v61 = vmul.f32 %v575_v7, %v532_v26  ;;  %v652_v12 = vmul.f32 %v648_v43, %v575_v7  ;;  %v3819_v29 = vpop.permute.xlu2 %824  ;;  %v3840_v26 = vmul.f32 2.09165, %v4197_v62 }
 0x24a   : > { %822 = vrot.lane.b32.xlu1 %v584_v61, %s2690_s16  ;;  %630 = vrot.lane.b32.xlu2 %v620_v41, %s2684_s27  ;;  %v3801_v33 = vpop.f32.mrf.mxu2  ;;  %s2693_s27 = smov 12  }
 0x24b   : > { %v2478_v2 = vmul.f32 -1.442695, %v3801_v33 }
 0x24d   : > { %2591 = vpow2.f32 %v2478_v2 }
 0x24e   : > { %v3795_v11 = vpop.permute.xlu1 %726 }
 0x24f   : > { %v751_v52 = vpop.permute.xlu0 %750 }
 0x250   : > { %v760_v27 = vsub.f32 %v3441_v42, %v751_v52 }
 0x252   : > { %886 = vrot.lane.b32.xlu1 %v688_v3, %s2686_s29  ;;  %730 = vrot.lane.b32.xlu2 %v608_v55, %s2689_s21  ;;  %v764_v47 = vmul.f32 %v760_v27, %v3811_v21  ;;  %s353_s21 = sand.u32 1, %s2663_s10  }
 0x253   : > { %v2592_v31 = vpop.eup %2591  ;;  %s354_s28 = scalar_lea.vmem [#allocation2], %s353_s21 }
 0x254   : > { %v1829_v19 = vadd.f32 1.0, %v2592_v31 }
 0x256   : > { %v793_v53 = vpop.permute.xlu1 %792  ;;  %2593 = vrcp.f32 %v1829_v19  ;;  %v1844_v51 = vand.u32 2147483648, %v1829_v19  ;;  %vm1838_vm12 = vweird.f32 %v1829_v19  ;;  %v1842_v2 = vand.u32 2147483647, %v1829_v19 }
 0x257   : > { %v3815_v35 = vpop.permute.xlu0 %806  ;;  %v976_v59 = vsel %vm972_vm7, %v971_v17, %v793_v53 }
 0x258   : > { %v981_v42 = vsel %vm977_vm8, %v976_v59, %v793_v53  ;;  %v1845_v31 = vor.u32 1.1754944e-38, %v1844_v51  ;;  %vm1843_vm14 = vcmp.eq.f32.partialorder %v1842_v2, 8.507059e+37 }
 0x259   : > { %v986_v38 = vsel %vm982_vm9, %v981_v42, %v3756_v16 }
 0x25a   : > { %950 = vrot.lane.b32.xlu1 %v764_v47, %s2692_s22  ;;  %870 = vrot.lane.b32.xlu2 %v652_v12, %s2686_s29  ;;  %v960_v12 = vsel %vm958_vm6, 1.0, %v3760_v10 }
 0x25c   : > { %v2594_v55 = vpop.eup %2593 }
 0x25d   : > { %vm1839_vm11 = vweird.f32 %v2594_v55 }
 0x25e   : > { %vm3859_vm13 = vmor %vm1838_vm12, %vm1839_vm11 }
 0x25f   : > { %v3826_v60 = vpop.permute.xlu0 %902 }
 0x262   : > { %918 = vrot.lane.b32.xlu2 %v716_v28, %s2691_s25  ;;  %s2346_s25 = scalar_lea.hbm %s4136_s9, %s2767_s13  ;;  %s2629_s13 = scalar_lea.hbm %s4136_s9, 2 }
 0x263   : > { %v633_v34 = vpop.permute.xlu2 %632  ;;  %v2036_v52 = vpop.f32.mrf.mxu1  ;;  %s2350_s29 = sshll.u32 %s2346_s25, 4  ;;  %s2351_s29 = int_to_ptr.hbm [resolvable:$true] %s2350_s29 }
 0x264   : > { %v641_v13 = vmul.f32 %v633_v34, %v3774_v8  ;;  %v1834_v8 = vmul.f32 %v2594_v55, %v1829_v19  ;;  %v965_v19 = vsel %vm963_vm4, %v960_v12, %v3760_v10  ;;  %v383_v34 = vld [vmem:[%s4132_s5 + $0x18] sm:$0xff] }
 0x265   : > { %1922 = vmatpush.msrb.mxu3 %v383_v34 }
 0x266   : > { %856 = vrot.lane.b32.xlu0 %v641_v13, %s2688_s17  ;;  %v1835_v15 = vsub.f32 1.0, %v1834_v8  ;;  %v382_v13 = vld [vmem:[%s4132_s5 + $0x10] sm:$0xff] }
 0x267   : > { %v819_v25 = vpop.permute.xlu0 %818  ;;  %1923 = vmatpush.msrb.mxu3 %v382_v13 }
 0x268   : > { %v3834_v58 = vsel %vm987_vm10, %v983_v63, %v819_v25  ;;  %v3836_v16 = vpop.f32.mrf.mxu2  ;;  %v1836_v54 = vmul.f32 %v2594_v55, %v1835_v15 }
 0x269   : > { %v2479_v39 = vmul.f32 -1.442695, %v3836_v16 }
 0x26a   : > { %v1837_v3 = vadd.f32 %v2594_v55, %v1836_v54 }
 0x26b   : > { %2595 = vpow2.f32 %v2479_v39  ;;  %v3846_v63 = vpop.permute.xlu2 %872  ;;  %v2039_v25 = vpop.f32.mrf.mxu1 }
 0x26c   : > { %v1841_v1 = vsel %vm3859_vm13, %v2594_v55, %v1837_v3  ;;  %v991_v55 = vsel %vm987_vm10, %v986_v38, %v3819_v29  ;;  %2072 = vmatpush.msra.mxu2 %v2039_v25 }
 0x26d   : > { %v1846_v39 = vsel %vm1843_vm14, %v1845_v31, %v1841_v1 }
 0x26e   : > { %2073 = vmatpush.msra.mxu2 %v2036_v52  ;;  %v1893_v38 = vmul.f32 %v1846_v39, %v3801_v33  ;;  %v719_v39 = vmul.f32 5.1234756, %v4208_v4 }
 0x26f   : > { %v627_v57 = vpop.permute.xlu0 %626  ;;  %2491 = vmatmul.msk.f32.vlgmr.msra.gmra.mxu2 %vm419_vm0, %v3403_v9 }
 0x270   : > { %v638_v18 = vmul.f32 %v627_v57, %v3840_v26  ;;  %v381_v57 = vld [vmem:[%s4132_s5 + $0x8] sm:$0xff] }
 0x271   : > { %v2596_v7 = vpop.eup %2595  ;;  %1924 = vmatpush.msrb.mxu3 %v381_v57 }
 0x272   : > { %850 = vrot.lane.b32.xlu1 %v638_v18, %s2688_s17  ;;  %v3848_v41 = vadd.f32 1.0, %v2596_v7  ;;  %v969_v18 = vsel %vm461_vm1, %v965_v19, %v3760_v10  ;;  %v380_v10 = vld [vmem:[%s4132_s5] sm:$0xff] }
 0x273   : > { %1925 = vmatpush.msrb.mxu3 %v380_v10 }
 0x274   : > { %v3850_v61 = vpop.permute.xlu1 %914  ;;  %2597 = vrcp.f32 %v3848_v41  ;;  %v1859_v7 = vand.u32 2147483648, %v3848_v41  ;;  %vm1853_vm2 = vweird.f32 %v3848_v41  ;;  %v1857_v3 = vand.u32 2147483647, %v3848_v41  ;;  %2482 = vmatmul.msk.f32.vlgmr.msrb.gmra.mxu3 %vm1897_vm3, %v1893_v38 }
 0x275   : > { %v961_v38 = vsel %vm958_vm6, 1.0, %v3749_v48 }
 0x276   : > { %vm1858_vm12 = vcmp.eq.f32.partialorder %v1857_v3, 8.507059e+37  ;;  %v966_v10 = vsel %vm963_vm4, %v961_v38, %v3749_v48 }
 0x277   : > { %2492 = vmatmul.msk.f32.gmra.mxu2 %vm419_vm0, %v3453_v32 }
 0x27a   : > { %v2598_v27 = vpop.eup %2597 }
 0x27b   : > { %v1849_v59 = vmul.f32 %v2598_v27, %v3848_v41  ;;  %vm1854_vm15 = vweird.f32 %v2598_v27 }
 0x27c   : > { %v3853_v20 = vpop.f32.mrf.mxu2  ;;  %v733_v53 = vpop.permute.xlu1 %732  ;;  %vm3895_vm11 = vmor %vm1853_vm2, %vm1854_vm15 }
 0x27d   : > { %v2480_v43 = vmul.f32 -1.442695, %v3853_v20  ;;  %v629_v17 = vpop.permute.xlu2 %628  ;;  %v741_v42 = vmul.f32 %v733_v53, %v721_v56  ;;  %v1850_v28 = vsub.f32 1.0, %v1849_v59  ;;  %v1860_v59 = vor.u32 1.1754944e-38, %v1859_v7 }
 0x27f   : > { %2599 = vpow2.f32 %v2480_v43  ;;  %936 = vrot.lane.b32.xlu2 %v741_v42, %s2693_s27  ;;  %v1851_v8 = vmul.f32 %v2598_v27, %v1850_v28  ;;  %v639_v43 = vmul.f32 %v629_v17, %v3713_v49  ;;  %2493 = vmatmul.msk.f32.gmra.mxu2 %vm419_vm0, %v3659_v40 }
 0x281   : > { %v1852_v15 = vadd.f32 %v2598_v27, %v1851_v8 }
 0x283   : > { %v1856_v12 = vsel %vm3895_vm11, %v2598_v27, %v1852_v15 }
 0x284   : > { %v3883_v54 = vpop.f32.mrf.mxu2  ;;  %v789_v56 = vpop.permute.xlu1 %788  ;;  %v1861_v49 = vsel %vm1858_vm12, %v1860_v59, %v1856_v12  ;;  %v970_v12 = vsel %vm461_vm1, %v966_v10, %v3749_v48  ;;  %vm997_vm1 = vcmask 72704  }
 0x285   : > { %v2600_v29 = vpop.eup %2599  ;;  %v2481_v51 = vmul.f32 -1.442695, %v3883_v54  ;;  %v841_v2 = vpop.permute.xlu2 %840  ;;  %v974_v41 = vsel %vm972_vm7, %v969_v18, %v789_v56  ;;  %v1894_v42 = vmul.f32 %v1861_v49, %v3836_v16 }
 0x286   : > { %v1831_v33 = vadd.f32 1.0, %v2600_v29  ;;  %v3902_v53 = vsel %vm992_vm5, %v991_v55, %v841_v2  ;;  %v979_v47 = vsel %vm977_vm8, %v974_v41, %v789_v56  ;;  %v718_v41 = vmul.f32 5.1234756, %v4197_v62 }
 0x287   : > { %2601 = vpow2.f32 %v2481_v51  ;;  %852 = vrot.lane.b32.xlu2 %v639_v43, %s2688_s17  ;;  %v984_v1 = vsel %vm982_vm9, %v979_v47, %v3781_v44  ;;  %2483 = vmatmul.msk.f32.gmra.mxu3 %vm1897_vm3, %v1894_v42 }
 0x288   : > { %2603 = vrcp.f32 %v1831_v33  ;;  %v1874_v16 = vand.u32 2147483648, %v1831_v33  ;;  %v1872_v44 = vand.u32 2147483647, %v1831_v33  ;;  %vm1868_vm14 = vweird.f32 %v1831_v33  ;;  %2494 = vmatmul.msk.f32.gmra.mxu2 %vm419_vm0, %v3506_v5 }
 0x28a   : > { %v1875_v7 = vor.u32 1.1754944e-38, %v1874_v16  ;;  %vm1873_vm2 = vcmp.eq.f32.partialorder %v1872_v44, 8.507059e+37 }
 0x28c   : > { %v821_v31 = vpop.permute.xlu1 %820 }
 0x28d   : > { %v2602_v17 = vpop.eup %2601  ;;  %v3912_v27 = vpop.permute.xlu2 %888  ;;  %v3917_v34 = vsel %vm987_vm10, %v984_v1, %v821_v31 }
 0x28e   : > { %v2604_v28 = vpop.eup %2603  ;;  %v1832_v19 = vadd.f32 1.0, %v2602_v17 }
 0x28f   : > { %v1864_v13 = vmul.f32 %v2604_v28, %v1831_v33  ;;  %vm1869_vm13 = vweird.f32 %v2604_v28 }
 0x290   : > { %2605 = vrcp.f32 %v1832_v19  ;;  %vm1870_vm15 = vmor %vm1868_vm14, %vm1869_vm13  ;;  %v1889_v52 = vand.u32 2147483648, %v1832_v19  ;;  %v1887_v43 = vand.u32 2147483647, %v1832_v19  ;;  %vm1883_vm6 = vweird.f32 %v1832_v19 }
 0x291   : > { %v1865_v25 = vsub.f32 1.0, %v1864_v13  ;;  %vm1027_vm13 = vcmask 121856  }
 0x292   : > { %v1890_v49 = vor.u32 1.1754944e-38, %v1889_v52  ;;  %vm1888_vm12 = vcmp.eq.f32.partialorder %v1887_v43, 8.507059e+37 }
 0x293   : > { %v1866_v55 = vmul.f32 %v2604_v28, %v1865_v25 }
 0x294   : > { %v729_v57 = vpop.permute.xlu1 %728 }
 0x295   : > { %v1867_v8 = vadd.f32 %v2604_v28, %v1866_v55  ;;  %v3921_v18 = vpop.permute.xlu2 %916  ;;  %v739_v29 = vmul.f32 %v729_v57, %v719_v39  ;;  %v867_v39 = vpop.permute.xlu0 %866 }
 0x296   : > { %v2606_v15 = vpop.eup %2605 }
 0x297   : > { %v1871_v3 = vsel %vm1870_vm15, %v2604_v28, %v1867_v8  ;;  %v1879_v51 = vmul.f32 %v2606_v15, %v1832_v19  ;;  %932 = vrot.lane.b32.xlu2 %v739_v29, %s2693_s27  ;;  %vm1884_vm11 = vweird.f32 %v2606_v15  ;;  %v720_v19 = vmul.f32 5.1234756, %v3369_v45 }
 0x298   : > { %v1876_v56 = vsel %vm1873_vm2, %v1875_v7, %v1871_v3  ;;  %vm1885_vm4 = vmor %vm1883_vm6, %vm1884_vm11 }
 0x299   : > { %v1895_v4 = vmul.f32 %v1876_v56, %v3853_v20  ;;  %v1880_v2 = vsub.f32 1.0, %v1879_v51  ;;  %v738_v20 = vmul.f32 %v3795_v11, %v718_v41 }
 0x29b   : > { %v1881_v33 = vmul.f32 %v2606_v15, %v1880_v2  ;;  %2484 = vmatmul.msk.f32.gmra.mxu3 %vm1897_vm3, %v1895_v4 }
 0x29c   : > { %v869_v16 = vpop.permute.xlu1 %868 }
 0x29d   : > { %v1882_v47 = vadd.f32 %v2606_v15, %v1881_v33  ;;  %v791_v59 = vpop.permute.xlu2 %790  ;;  %v883_v8 = vpop.permute.xlu0 %882 }
 0x29e   : > { %v975_v17 = vsel %vm972_vm7, %v970_v12, %v791_v59  ;;  %vm1002_vm7 = vcmask 80896  }
 0x29f   : > { %v1886_v42 = vsel %vm1885_vm4, %v2606_v15, %v1882_v47  ;;  %v980_v1 = vsel %vm977_vm8, %v975_v17, %v791_v59  ;;  %930 = vrot.lane.b32.xlu2 %v738_v20, %s2693_s27  ;;  %vm1007_vm8 = vcmask 89088  }
 0x2a0   : > { %v1891_v62 = vsel %vm1888_vm12, %v1890_v49, %v1886_v42  ;;  %v985_v48 = vsel %vm982_vm9, %v980_v1, %v3815_v35  ;;  %v758_v35 = vsub.f32 %v4199_v6, %v3657_v50  ;;  %vm1012_vm9 = vcmask 97280  }
 0x2a1   : > { %v1896_v31 = vmul.f32 %v1891_v62, %v3883_v54 }
 0x2a2   : > { %v762_v54 = vmul.f32 %v758_v35, %v3840_v26 }
 0x2a3   : > { %2485 = vmatmul.msk.f32.gmra.mxu3 %vm1897_vm3, %v1896_v31 }
 0x2a5   : > { %v631_v28 = vpop.permute.xlu2 %630  ;;  %v837_v26 = vpop.permute.xlu0 %836 }
 0x2a6   : > { %v640_v11 = vmul.f32 %v631_v28, %v3811_v21  ;;  %v953_v21 = vpop.permute.xlu1 %952  ;;  %v994_v10 = vsel %vm992_vm5, %v3917_v34, %v837_v26 }
 0x2a8   : > { %854 = vrot.lane.b32.xlu0 %v640_v11, %s2688_s17  ;;  %s2623_s17 = sshra.s32 %s2351_s29, 4  ;;  %s2624_s17 = int_to_ptr.hbm [resolvable:$true] %s2623_s17 }
 0x2a9   : > { %p2630_p0 = scmp.lt.s32.totalorder %s2624_s17, %s4136_s9 }
 0x2ad   : > { %v731_v13 = vpop.permute.xlu2 %730  ;;  %v921_v15 = vpop.permute.xlu0 %920 }
 0x2ae   : > { %v740_v25 = vmul.f32 %v731_v13, %v720_v19 }
 0x2b0   : > { %948 = vrot.lane.b32.xlu0 %v3719_v36, %s2692_s22  ;;  %934 = vrot.lane.b32.xlu1 %v740_v25, %s2693_s27  ;;  %v993_v36 = vsel %vm992_vm5, %v3834_v58, %v3797_v14  ;;  %s2695_s27 = smov 92  }
 0x2b5   : > { %v871_v7 = vpop.permute.xlu2 %870  ;;  %v885_v29 = vpop.permute.xlu0 %884 }
 0x2b8   : > { %946 = vrot.lane.b32.xlu1 %v762_v54, %s2692_s22 }
 0x2bc   : > { %v823_v55 = vpop.permute.xlu1 %822 }
 0x2bd   : > { %v919_v38 = vpop.permute.xlu2 %918  ;;  %v839_v51 = vpop.permute.xlu0 %838  ;;  %v990_v33 = vsel %vm987_vm10, %v985_v48, %v823_v55  ;;  %vm1017_vm10 = vcmask 105472  }
 0x2be   : > { %v995_v34 = vsel %vm992_vm5, %v990_v33, %v839_v51  ;;  %vm1022_vm5 = vcmask 113664  }
 0x2c4   : > { %v887_v44 = vpop.permute.xlu1 %886 }
 0x2cc   : > { %v951_v45 = vpop.permute.xlu1 %950 }
 0x2d8   : > { %v857_v4 = vpop.permute.xlu0 %856 }
 0x2d9   : > { %v937_v3 = vpop.permute.xlu2 %936  ;;  %v1001_v14 = vsel %vm997_vm1, %v3902_v53, %v857_v4 }
 0x2da   : > { %v1006_v43 = vsel %vm1002_vm7, %v1001_v14, %v3846_v63 }
 0x2db   : > { %v1011_v12 = vsel %vm1007_vm8, %v1006_v43, %v3912_v27  ;;  %v4009_v43 = vld [vmem:[%s2837_s23] sm:$0xff] }
 0x2dc   : > { %v1016_v49 = vsel %vm1012_vm9, %v1011_v12, %v3771_v24 }
 0x2dd   : > { %v1021_v62 = vsel %vm1017_vm10, %v1016_v49, %v921_v15 }
 0x2de   : > { %v1026_v19 = vsel %vm1022_vm5, %v1021_v62, %v937_v3  ;;  %v388_v62 = vld [vmem:[%s4133_s6 + $0x20] sm:$0xff] }
 0x2e1   : > { %v853_v2 = vpop.permute.xlu2 %852 }
 0x2e2   : > { %v999_v52 = vsel %vm997_vm1, %v994_v10, %v853_v2 }
 0x2e3   : > { %v1004_v41 = vsel %vm1002_vm7, %v999_v52, %v869_v16  ;;  %v1031_v16 = vsel %vm1027_vm13, %v1026_v19, %v953_v21 }
 0x2e4   : > { %v851_v57 = vpop.permute.xlu1 %850  ;;  %v1009_v53 = vsel %vm1007_vm8, %v1004_v41, %v885_v29 }
 0x2e5   : > { %v998_v6 = vsel %vm997_vm1, %v993_v36, %v851_v57  ;;  %v1014_v27 = vsel %vm1012_vm9, %v1009_v53, %v3736_v0 }
 0x2e6   : > { %v1003_v50 = vsel %vm1002_vm7, %v998_v6, %v867_v39  ;;  %v1019_v48 = vsel %vm1017_vm10, %v1014_v27, %v3921_v18 }
 0x2e7   : > { %v1008_v0 = vsel %vm1007_vm8, %v1003_v50, %v883_v8 }
 0x2e8   : > { %v1013_v18 = vsel %vm1012_vm9, %v1008_v0, %v3743_v37  ;;  %v393_v0 = vld [vmem:[%s4133_s6 + $0x48] sm:$0xff] }
 0x2e9   : > { %v1018_v36 = vsel %vm1017_vm10, %v1013_v18, %v3850_v61 }
 0x2f1   : > { %v933_v63 = vpop.permute.xlu2 %932 }
 0x2f2   : > { %v1024_v31 = vsel %vm1022_vm5, %v1019_v48, %v933_v63  ;;  %v2075_v61 = vpop.f32.mrf.mxu2  ;;  %v395_v48 = vld [vmem:[%s4133_s6 + $0x58] sm:$0xff] }
 0x2f3   : > { %2182 = vmatpush.msrb.mxu1 %v395_v48 }
 0x2f7   : > { %v1927_v56 = vpop.f32.mrf.mxu3 }
 0x2f9   : > { %v931_v39 = vpop.permute.xlu2 %930 }
 0x2fa   : > { %v1023_v6 = vsel %vm1022_vm5, %v1018_v36, %v931_v39  ;;  %v2078_v15 = vpop.f32.mrf.mxu2  ;;  %v399_v36 = vld [vmem:[%s4133_s6 + $0x78] sm:$0xff] }
 0x30a   : > { %v1930_v58 = vpop.f32.mrf.mxu3 }
 0x31a   : > { %v855_v47 = vpop.permute.xlu0 %854 }
 0x31b   : > { %v1000_v59 = vsel %vm997_vm1, %v995_v34, %v855_v47  ;;  %v4015_v47 = vld [vmem:[%s2837_s23 + $0x8] sm:$0xff]  ;;  %s2625_s23 = scalar_lea.hbm %s2624_s17, 1 }
 0x31c   : > { %v1005_v20 = vsel %vm1002_vm7, %v1000_v59, %v871_v7  ;;  %v2081_v7 = vpop.f32.mrf.mxu2  ;;  %p2626_p11 = scmp.ne.s32.totalorder %s2624_s17, %s2625_s23  ;;  %p2631_p1 = scmp.lt.s32.totalorder %s2629_s13, %s2625_s23 }
 0x31d   : > { %v1010_v17 = vsel %vm1007_vm8, %v1005_v20, %v887_v44  ;;  %v391_v20 = vld [vmem:[%s4133_s6 + $0x38] sm:$0xff] }
 0x31e   : > { %v1933_v42 = vpop.f32.mrf.mxu3  ;;  %v1015_v1 = vsel %vm1012_vm9, %v1010_v17, %v3826_v60  ;;  %2138 = vmatpush.msra.mxu3 %v391_v20  ;;  %p2627_p12 = pnand %p2626_p11, %p2784_p5  ;;  %p2632_p2 = por %p2631_p1, %p2630_p0 }
 0x31f   : > { %v1020_v11 = vsel %vm1017_vm10, %v1015_v1, %v919_v38  ;;  %v389_v1 = vld [vmem:[%s4133_s6 + $0x28] sm:$0xff] }
 0x320   : > { %p2628_p13 = pneg %p2627_p12 }
 0x322   : > { %v949_v24 = vpop.permute.xlu0 %948  ;;  %v935_v28 = vpop.permute.xlu1 %934  ;;  %p2633_p3 = pnand %p2632_p2, %p2628_p13 }
 0x323   : > { %v1029_v13 = vsel %vm1027_vm13, %v1024_v31, %v949_v24  ;;  %v1025_v60 = vsel %vm1022_vm5, %v1020_v11, %v935_v28  ;;  %v394_v31 = vld [vmem:[%s4133_s6 + $0x50] sm:$0xff] }
 0x324   : > { %v1940_v25 = vmul.f32 %v1930_v58, %v1029_v13  ;;  %v1030_v35 = vsel %vm1027_vm13, %v1025_v60, %v951_v45  ;;  %v2084_v38 = vpop.f32.mrf.mxu2  ;;  %2183 = vmatpush.msrb.mxu1 %v394_v31  ;;  %v2581_v60 = vld [vmem:[%s4135_s8] ss:$0 sm:$0xff] }
 0x325   : > { %v1941_v54 = vmul.f32 %v1933_v42, %v1030_v35 }
 0x326   : > { %v1936_v55 = vpop.f32.mrf.mxu3  ;;  %v1946_v44 = vsel %vm419_vm0, %v1940_v25, 0.0  ;;  %2184 = vmatpush.msrb.mxu1 %v393_v0 }
 0x327   : > { %v1942_v57 = vmul.f32 %v1936_v55, %v1031_v16  ;;  %1947 = vadd.xlane.f32.xlu1 %v1946_v44  ;;  %v1949_v8 = vsel %vm419_vm0, %v1941_v54, 0.0 }
 0x328   : > { %1950 = vadd.xlane.f32.xlu2 %v1949_v8 }
 0x329   : > { %v1952_v45 = vsel %vm419_vm0, %v1942_v57, 0.0 }
 0x32a   : > { %1953 = vadd.xlane.f32.xlu0 %v1952_v45  ;;  %v947_v37 = vpop.permute.xlu1 %946  ;;  %v398_v45 = vld [vmem:[%s4133_s6 + $0x70] sm:$0xff] }
 0x32b   : > { %v1028_v21 = vsel %vm1027_vm13, %v1023_v6, %v947_v37 }
 0x32c   : > { %v1939_v50 = vmul.f32 %v1927_v56, %v1028_v21 }
 0x32e   : > { %v1943_v26 = vsel %vm419_vm0, %v1939_v50, 0.0 }
 0x332   : > { %1944 = vadd.xlane.f32.xlu0 %v1943_v26 }
 0x340   : > { %1965 = vrot.lane.b32.xlu2 %v1936_v55, %s2674_s24  ;;  %1963 = vrot.lane.b32.xlu1 %v1933_v42, %s2674_s24  ;;  %v390_v42 = vld [vmem:[%s4133_s6 + $0x30] sm:$0xff] }
 0x341   : > { %2139 = vmatpush.msra.mxu3 %v390_v42 }
 0x343   : > { %2140 = vmatpush.msra.mxu3 %v389_v1 }
 0x345   : > { %2141 = vmatpush.msra.mxu3 %v388_v62 }
 0x346   : > { %1961 = vrot.lane.b32.xlu0 %v1930_v58, %s2674_s24 }
 0x348   : > { %1959 = vrot.lane.b32.xlu2 %v1927_v56, %s2674_s24  ;;  %s2338_s24 = scalar_lea.sflag [#allocation3], %s353_s21 }
 0x39a   : > { %v1948_v2 = vpop.xlane.xlu1 %1947 }
 0x39b   : > { %v1951_v29 = vpop.xlane.xlu2 %1950  ;;  %v2088_v10 = vmul.f32 %v2078_v15, %v1948_v2  ;;  %v397_v15 = vld [vmem:[%s4133_s6 + $0x68] sm:$0xff] }
 0x39c   : > { %v2089_v4 = vmul.f32 %v2081_v7, %v1951_v29  ;;  %v396_v7 = vld [vmem:[%s4133_s6 + $0x60] sm:$0xff] }
 0x39d   : > { %v1954_v3 = vpop.xlane.xlu0 %1953 }
 0x39e   : > { %v2090_v51 = vmul.f32 %v2084_v38, %v1954_v3 }
 0x3a0   : > { %2107 = vmatpush.msrb.mxu0 %v2090_v51 }
 0x3a2   : > { %2108 = vmatpush.msrb.mxu0 %v2089_v4  ;;  %v2582_v4 = vld [vmem:[%s4135_s8 + $0x1] ss:$0 sm:$0xff] }
 0x3a3   : > { %v1966_v14 = vpop.permute.xlu2 %1965 }
 0x3a4   : > { %2109 = vmatpush.msrb.mxu0 %v2088_v10  ;;  %v1974_v52 = vmul.f32 %v1966_v14, %v1031_v16 }
 0x3a5   : > { %v1945_v58 = vpop.xlane.xlu0 %1944 }
 0x3a6   : > { %v2087_v33 = vmul.f32 %v2075_v61, %v1945_v58  ;;  %v1984_v56 = vsel %vm419_vm0, %v1974_v52, 0.0 }
 0x3a7   : > { %1985 = vadd.xlane.f32.xlu0 %v1984_v56 }
 0x3a8   : > { %2110 = vmatpush.msrb.mxu0 %v2087_v33 }
 0x3a9   : > { %2495 = vmatmul.msk.f32.vlgmr.msrb.gmra.mxu0 %vm1897_vm3, %v4009_v43 }
 0x3ab   : > { %v1960_v41 = vpop.permute.xlu2 %1959 }
 0x3ac   : > { %v1971_v12 = vmul.f32 %v1960_v41, %v1028_v21 }
 0x3ae   : > { %v1975_v34 = vsel %vm419_vm0, %v1971_v12, 0.0 }
 0x3af   : > { %1976 = vadd.xlane.f32.xlu0 %v1975_v34 }
 0x3b1   : > { %2496 = vmatmul.msk.f32.gmra.mxu0 %vm1897_vm3, %v4015_v47 }
 0x3b2   : > { %v1964_v53 = vpop.permute.xlu1 %1963 }
 0x3b3   : > { %v1973_v59 = vmul.f32 %v1964_v53, %v1030_v35 }
 0x3b5   : > { %v1981_v49 = vsel %vm419_vm0, %v1973_v59, 0.0  ;;  %v2694_v59 = vmov 32  }
 0x3b6   : > { %1982 = vadd.xlane.f32.xlu1 %v1981_v49  ;;  %2579 = vset.pattern.permute.xlu2 %v2694_v59 }
 0x3b7   : > { %2580 = vset.pattern.permute.xlu0 %v2694_v59 }
 0x3b8   : > { %v1962_v63 = vpop.permute.xlu0 %1961 }
 0x3b9   : > { %v1972_v17 = vmul.f32 %v1962_v63, %v1029_v13  ;;  %v392_v13 = vld [vmem:[%s4133_s6 + $0x40] sm:$0xff] }
 0x3ba   : > { %2185 = vmatpush.msrb.mxu1 %v392_v13 }
 0x3bb   : > { %v1978_v27 = vsel %vm419_vm0, %v1972_v17, 0.0 }
 0x3bc   : > { %1979 = vadd.xlane.f32.xlu2 %v1978_v27  ;;  %2277 = vmatpush.msra.mxu1 %v399_v36 }
 0x3be   : > { %2278 = vmatpush.msra.mxu1 %v398_v45 }
 0x3c0   : > { %2279 = vmatpush.msra.mxu1 %v397_v15 }
 0x3c2   : > { %2280 = vmatpush.msra.mxu1 %v396_v7 }
 0x3cf   : > { %2253 = vrot.lane.b32.xlu1 %v3830_v22, %s2673_s14 }
 0x3d4   : > { %2255 = vrot.lane.b32.xlu2 %v3842_v30, %s2673_s14  ;;  %s2348_s14 = sshll.u32 %s354_s28, 4  ;;  %s2349_s14 = int_to_ptr.vmem [resolvable:$true] %s2348_s14 }
 0x426   : > { %v2112_v24 = vpop.f32.mrf.mxu0 }
 0x427   : > { %v2118_v28 = vmul.f32 0.25, %v2112_v24 }
 0x429   : > { %2497 = vmatmul.msk.f32.vlgmr.msra.gmra.mxu3 %vm1897_vm3, %v2118_v28 }
 0x42e   : > { %v2115_v11 = vpop.f32.mrf.mxu0 }
 0x42f   : > { %v2119_v19 = vmul.f32 0.25, %v2115_v11 }
 0x431   : > { %2498 = vmatmul.msk.f32.gmra.mxu3 %vm1897_vm3, %v2119_v19 }
 0x4ac   : > { %v2143_v25 = vpop.f32.mrf.mxu3 }
 0x4ad   : > { %v2144_v35 = vadd.f32 %v2143_v25, %v3830_v22 }
 0x4af   : > { %2499 = vmatmul.msk.f32.vlgmr.msrb.gmra.mxu1 %vm1897_vm3, %v2144_v35  ;;  %v2152_v54 = vmul.f32 %v2581_v60, %v2144_v35 }
 0x4b1   : > { %v2154_v18 = vsel %vm1897_vm3, %v2152_v54, 0.0 }
 0x4b2   : > { %2155 = vadd.xlane.f32.xlu0 %v2154_v18 }
 0x4b4   : > { %v2146_v16 = vpop.f32.mrf.mxu3 }
 0x4b5   : > { %v2147_v55 = vadd.f32 %v2146_v16, %v3842_v30 }
 0x4b7   : > { %2500 = vmatmul.msk.f32.gmra.mxu1 %vm1897_vm3, %v2147_v55  ;;  %v2153_v44 = vmul.f32 %v2581_v60, %v2147_v55 }
 0x4b9   : > { %v2157_v39 = vsel %vm1897_vm3, %v2153_v44, 0.0 }
 0x4ba   : > { %2158 = vadd.xlane.f32.xlu0 %v2157_v39 }
 0x52c   : > { %v2187_v57 = vpop.f32.mrf.mxu1 }
 0x534   : > { %v2190_v8 = vpop.f32.mrf.mxu1 }
 0x535   : > { %2207 = vmatpush.msra.mxu0 %v2190_v8 }
 0x537   : > { %2208 = vmatpush.msra.mxu0 %v2187_v57 }
 0x538   : > { %2501 = vmatmul.msk.f32.vlgmr.msra.gmra.mxu0 %vm419_vm0, %v3403_v9 }
 0x540   : > { %2502 = vmatmul.msk.f32.gmra.mxu0 %vm419_vm0, %v3453_v32  ;;  %v1986_v32 = vpop.xlane.xlu0 %1985 }
 0x548   : > { %2503 = vmatmul.msk.f32.gmra.mxu0 %vm419_vm0, %v3659_v40  ;;  %v1983_v40 = vpop.xlane.xlu1 %1982  ;;  %v1977_v26 = vpop.xlane.xlu0 %1976 }
 0x550   : > { %2504 = vmatmul.msk.f32.gmra.mxu0 %vm419_vm0, %v3506_v5  ;;  %v1980_v5 = vpop.xlane.xlu2 %1979  ;;  %v2254_v2 = vpop.permute.xlu1 %2253  ;;  %vm2321_vm0 = vcmask 326944  }
 0x551   : > { %v2156_v53 = vpop.xlane.xlu0 %2155 }
 0x552   : > { %v2160_v63 = vmul.f32 0.17677669, %v2156_v53 }
 0x558   : > { %v2256_v33 = vpop.permute.xlu2 %2255 }
 0x559   : > { %v2159_v20 = vpop.xlane.xlu0 %2158 }
 0x55a   : > { %v2161_v48 = vmul.f32 0.17677669, %v2159_v20 }
 0x5b5   : > { %v2210_v22 = vpop.f32.mrf.mxu0 }
 0x5b6   : > { %v2222_v61 = vmul.f32 %v2210_v22, %v1977_v26 }
 0x5bd   : > { %v2213_v30 = vpop.f32.mrf.mxu0 }
 0x5be   : > { %v2223_v50 = vmul.f32 %v2213_v30, %v1980_v5 }
 0x5c5   : > { %v2216_v9 = vpop.f32.mrf.mxu0 }
 0x5c6   : > { %v2224_v21 = vmul.f32 %v2216_v9, %v1983_v40 }
 0x5cd   : > { %v2219_v6 = vpop.f32.mrf.mxu0 }
 0x5ce   : > { %v2225_v37 = vmul.f32 %v2219_v6, %v1986_v32 }
 0x5d0   : > { %2238 = vmatpush.msrb.mxu3 %v2225_v37 }
 0x5d2   : > { %2239 = vmatpush.msrb.mxu3 %v2224_v21 }
 0x5d4   : > { %2240 = vmatpush.msrb.mxu3 %v2223_v50 }
 0x5d6   : > { %2241 = vmatpush.msrb.mxu3 %v2222_v61 }
 0x5d7   : > { %2505 = vmatmul.msk.f32.vlgmr.msrb.gmra.mxu3 %vm1897_vm3, %v4009_v43 }
 0x5df   : > { %2506 = vmatmul.msk.f32.gmra.mxu3 %vm1897_vm3, %v4015_v47 }
 0x65a   : > { %v2243_v29 = vpop.f32.mrf.mxu3 }
 0x65b   : > { %v2249_v38 = vmul.f32 0.25, %v2243_v29 }
 0x65d   : > { %2507 = vmatmul.msk.f32.vlgmr.msra.gmra.mxu1 %vm1897_vm3, %v2249_v38 }
 0x662   : > { %v2246_v3 = vpop.f32.mrf.mxu3 }
 0x663   : > { %v2250_v51 = vmul.f32 0.25, %v2246_v3 }
 0x665   : > { %2508 = vmatmul.msk.f32.gmra.mxu1 %vm1897_vm3, %v2250_v51 }
 0x6da   : > { %v2282_v10 = vpop.f32.mrf.mxu1 }
 0x6db   : > { %v2283_v14 = vadd.f32 %v2282_v10, %v2254_v2 }
 0x6dd   : > { %v2291_v52 = vmul.f32 %v2582_v4, %v2283_v14 }
 0x6df   : > { %v2293_v58 = vsel %vm1897_vm3, %v2291_v52, 0.0 }
 0x6e0   : > { %2294 = vadd.xlane.f32.xlu0 %v2293_v58 }
 0x6e2   : > { %v2285_v56 = vpop.f32.mrf.mxu1 }
 0x6e3   : > { %v2286_v41 = vadd.f32 %v2285_v56, %v2256_v33 }
 0x6e5   : > { %v2292_v12 = vmul.f32 %v2582_v4, %v2286_v41 }
 0x6e7   : > { %v2296_v34 = vsel %vm1897_vm3, %v2292_v12, 0.0  ;;  %vm2335_vm3 = vcmask 24576  }
 0x6e8   : > { %2297 = vadd.xlane.f32.xlu1 %v2296_v34 }
 0x753   : > { %v2295_v49 = vpop.xlane.xlu0 %2294 }
 0x754   : > { %v2299_v17 = vmul.f32 0.17677669, %v2295_v49 }
 0x756   : > { %v2301_v27 = vadd.f32 %v2299_v17, %v2160_v63 }
 0x758   : > { %v2303_v42 = vmul.f32 1.3, %v2301_v27 }
 0x75a   : > { %v2305_v1 = vadd.f32 %v2303_v42, %v3655_v23 }
 0x75b   : > { %v2298_v62 = vpop.xlane.xlu1 %2297 }
 0x75c   : > { %v2300_v31 = vmul.f32 0.17677669, %v2298_v62  ;;  %v2307_v24 = vadd.f32 0.1, %v2305_v1 }
 0x75e   : > { %v2302_v28 = vadd.f32 %v2300_v31, %v2161_v48  ;;  %2311 = vperm.xlu2 %2579, %v2307_v24  }
 0x760   : > { %v2304_v11 = vmul.f32 1.3, %v2302_v28 }
 0x762   : > { %v2306_v19 = vadd.f32 %v2304_v11, %v3678_v46 }
 0x764   : > { %v2308_v0 = vadd.f32 0.1, %v2306_v19 }
 0x766   : > { %2316 = vperm.xlu0 %2580, %v2308_v0  }
 0x7b8   : > { %v2312_v13 = vpop.permute.xlu2 %2311 }
 0x7b9   : > { %v2319_v60 = vmul.f32 %v4009_v43, %v2312_v13 }
 0x7bb   : > { %v2322_v35 = vsel %vm2321_vm0, %v2319_v60, 0.0 }
 0x7d8   : > { %v2317_v25 = vpop.permute.xlu0 %2316 }
 0x7d9   : > { %v2320_v23 = vmul.f32 %v4015_v47, %v2317_v25 }
 0x7db   : > { %v2323_v54 = vsel %vm2321_vm0, %v2320_v23, 0.0 }
 0x7dc   : > { %v2324_v18 = vadd.f32 %v2323_v54, %v2322_v35 }
 0x7de   : > { %v2325_v16 = vrot.slane %v2324_v18, 4 }
 0x7e0   : > { %v2326_v55 = vadd.f32 %v2325_v16, %v2324_v18 }
 0x7e2   : > { %v2327_v44 = vrot.slane %v2326_v55, 2 }
 0x7e4   : > { %v2328_v39 = vadd.f32 %v2327_v44, %v2326_v55 }
 0x7e6   : > { %v2329_v57 = vrot.slane %v2328_v39, 1 }
 0x7e8   : > { %v2330_v46 = vadd.f32 %v2329_v57, %v2328_v39 }
 0x7ea   : > { %2332 = vrot.lane.b32.xlu2 %v2330_v46, %s2695_s27 }
 0x844   : > { %v2333_v43 = vpop.permute.xlu2 %2332 }
 0x845   : > { %2336 = vst.msk [vmem:[%s354_s28] sm:$0x1] %vm2335_vm3, %v2333_v43 }
 0x846   : > { %2636 = shalt.err (!%p2633_p3)
}
 0x847   : > { %2517 = dma.vmem_to_hbm [thread:$0]  (%p2784_p5), %s2349_s14, 16, %s2351_s29, %s2338_s24  }
 0x848 PF: > { %p2523_p4 = scmp.ge.s32.totalorder %s2671_s12, 2  ;;  %s2362_s21 = sand.u32 1, %s2659_s30  }
 0x849   : > { %s2363_s25 = scalar_lea.sflag [#allocation3], %s2362_s21 }
 0x84a   : > { %p2520_p7 = pnand %p2523_p4, %p2788_p6 }
 0x84c   : > { %p2521_p8 = pneg %p2520_p7 }
 0x84e   : > { %2654 = dma.done.wait (%p2521_p8), %s2363_s25, 16  }
 0x84f   : > { %2656 = vsyncadd (%p2521_p8), %s2363_s25, 4294967280  ;;  %p19_p9 = scmp.ge.s32.totalorder %s2771_s15, 4   ;;  %s4216_s30 = smov %s2663_s10 }
 0x850   : > { %s4217_s10 = smov %s2667_s11  ;;  %s4218_s11 = smov %s2782_s18 }
 0x851   : > { %s4219_s12 = smov %s2771_s15  ;;  %21 = sbr.rel (!%p19_p9) target bundleno = 3 (0x3), region = 97 }
 0x856   :  { %2368 = vsyncpa [#allocation3], 1 }
 0x857   :  { %2370 = vsyncpa [#allocation3 + $0x1], 1 }

</bundles_post_ra>
